<compile_context>
chip_gen: v7x
topology: tpu7x:2x2x1
jax: 0.10.0
libtpu: 0.0.40
codegen_flags: <defaults>
</compile_context>

<pallas_src>
import functools

import jax
import jax.numpy as jnp
from jax.experimental import pallas as pl
from jax.experimental.pallas import tpu as pltpu


# ---------------------------------------------------------------------------
# Pallas kernel: fused  3x3 VALID conv  +  separable bilinear x2 upsample
# ---------------------------------------------------------------------------
def _deconv_kernel(x_ref, w_ref, b_ref, mh_ref, mwt_ref, o_ref, conv_ref):
    # x_ref    : (1, Cin, H*W)          bf16  flattened NCHW activation tile
    # w_ref    : (9, Cout, Cin)         bf16  conv weights, tap-major (kh*3+kw)
    # b_ref    : (Cout, 1)              f32
    # mh_ref   : (Hout, Hc)             f32   height interpolation matrix
    # mwt_ref  : (Wc, Wout)             f32   transposed width interp matrix
    # o_ref    : (1, Cout, Hout, Wout)  f32   output tile (NCHW layout)
    # conv_ref : (Cout, Hc, Wc)         f32   VMEM scratch for the conv result
    cout, hc, wc = conv_ref.shape
    hout = mh_ref.shape[0]
    wout = mwt_ref.shape[1]
    w_img = wc + 2                       # original image width
    lp = (hc - 1) * w_img + wc           # flat span covering all valid outputs

    # --- 3x3 VALID conv: 9 shifted MXU dots, bf16 x bf16 -> f32 accumulate ---
    # valid conv output (hc_i, wc_i) lives at flat position hc_i*W + wc_i; tap
    # (kh, kw) is a pure lane shift of kh*W + kw in the flattened image.
    acc = jnp.broadcast_to(b_ref[...], (cout, lp))            # start from bias
    for k in range(9):
        kh, kw = k // 3, k % 3
        off = kh * w_img + kw
        xs = x_ref[0, :, off:off + lp]                        # (Cin, Lp) bf16
        acc = acc + jnp.dot(w_ref[k], xs,
                            preferred_element_type=jnp.float32)

    # regroup the flat (row-stride = W) result into (Cout, Hc, Wc); the 2-wide
    # seam columns between rows are garbage and are dropped here.
    for r in range(hc):
        conv_ref[:, r, :] = acc[:, r * w_img:r * w_img + wc]

    conv = conv_ref[...]                                      # (Cout, Hc, Wc) f32

    # --- separable bilinear upsample (align_corners=True), f32 accumulation ---
    # width pass: batched over channels  (Cout, Hc, Wc) @ (Wc, Wout)
    mwt_b = jnp.broadcast_to(mwt_ref[...], (cout, wc, wout))  # (Cout, Wc, Wout)
    bw = jax.lax.dot_general(conv, mwt_b, (((2,), (1,)), ((0,), (0,))),
                             preferred_element_type=jnp.float32)   # (Cout, Hc, Wout)
    # height pass: batched over channels  (Hout, Hc) @ (Hc, Wout)
    mh_b = jnp.broadcast_to(mh_ref[...], (cout, hout, hc))    # (Cout, Hout, Hc)
    out = jax.lax.dot_general(mh_b, bw, (((2,), (1,)), ((0,), (0,))),
                              preferred_element_type=jnp.float32)  # (Cout, Hout, Wout)

    o_ref[0] = out.astype(o_ref.dtype)


# ---------------------------------------------------------------------------
# plain-JAX glue
# ---------------------------------------------------------------------------
def _interp_matrix(n_in: int, n_out: int) -> jnp.ndarray:
    """1-D linear interpolation operator (n_out, n_in), align_corners=True."""
    out_idx = jnp.arange(n_out, dtype=jnp.float32)
    if n_out > 1:
        src = out_idx * (n_in - 1) / (n_out - 1)
    else:
        src = jnp.zeros_like(out_idx)
    i0 = jnp.clip(jnp.floor(src).astype(jnp.int32), 0, n_in - 1)
    i1 = jnp.minimum(i0 + 1, n_in - 1)
    frac = src - i0.astype(jnp.float32)
    cols = jnp.arange(n_in)
    m = ((cols[None, :] == i0[:, None]).astype(jnp.float32) * (1.0 - frac)[:, None]
         + (cols[None, :] == i1[:, None]).astype(jnp.float32) * frac[:, None])
    return m.astype(jnp.float32)


@functools.partial(jax.jit, static_argnames=("scale_factor",))
def deconv_forward(x, weight, bias, *, scale_factor=2):
    """x: (N, Cin, H, W); weight: (Cout, Cin, 3, 3); bias: (Cout,).
    Returns (N, Cout, (H-2)*sf, (W-2)*sf) float32, matching the PyTorch module."""
    n, cin, h, w = x.shape
    cout = weight.shape[0]
    hc, wc = h - 2, w - 2
    hout, wout = hc * scale_factor, wc * scale_factor
    lp = (hc - 1) * w + wc

    # free metadata reshape -- no HBM pass, no 9x im2col inflation
    x_flat = x.astype(jnp.bfloat16).reshape(n, cin, h * w)
    # tap-major weights: w9[kh*3+kw, co, ci] = weight[co, ci, kh, kw]
    w9 = jnp.transpose(weight, (2, 3, 0, 1)).reshape(9, cout, cin).astype(jnp.bfloat16)
    b2d = bias.astype(jnp.float32).reshape(cout, 1)
    mh = _interp_matrix(hc, hout)                 # (Hout, Hc)   f32
    mwt = _interp_matrix(wc, wout).T              # (Wc,  Wout)  f32

    flops = n * (2 * 9 * cout * cin * lp            # conv
                 + 2 * cout * hc * wc * wout        # width pass
                 + 2 * cout * hout * hc * wout)     # height pass
    bytes_accessed = (n * cin * h * w * 2 + 9 * cout * cin * 2 + cout * 4
                      + (hout * hc + wc * wout) * 4
                      + n * cout * hout * wout * 4)

    return pl.pallas_call(
        _deconv_kernel,
        out_shape=jax.ShapeDtypeStruct((n, cout, hout, wout), jnp.float32),
        grid=(n,),
        in_specs=[
            pl.BlockSpec((1, cin, h * w), lambda i: (i, 0, 0)),
            pl.BlockSpec((9, cout, cin), lambda i: (0, 0, 0)),
            pl.BlockSpec((cout, 1), lambda i: (0, 0)),
            pl.BlockSpec((hout, hc), lambda i: (0, 0)),
            pl.BlockSpec((wc, wout), lambda i: (0, 0)),
        ],
        out_specs=pl.BlockSpec((1, cout, hout, wout), lambda i: (i, 0, 0, 0)),
        scratch_shapes=[pltpu.VMEM((cout, hc, wc), jnp.float32)],
        compiler_params=pltpu.CompilerParams(
            dimension_semantics=("parallel",),
            vmem_limit_bytes=32 * 1024 * 1024),
        cost_estimate=pl.CostEstimate(flops=flops, transcendentals=0,
                                      bytes_accessed=bytes_accessed),
    )(x_flat, w9, b2d, mh, mwt)


# ---------------------------------------------------------------------------
# pure-JAX reference (bf16 conv operands + f32 accumulation, like the kernel)
# ---------------------------------------------------------------------------
def deconv_reference(x, weight, bias, *, scale_factor=2):
    conv = jax.lax.conv_general_dilated(
        x.astype(jnp.bfloat16), weight.astype(jnp.bfloat16),
        window_strides=(1, 1), padding="VALID",
        dimension_numbers=("NCHW", "OIHW", "NCHW"),
        preferred_element_type=jnp.float32)
    conv = conv + bias.astype(jnp.float32)[None, :, None, None]
    hc, wc = conv.shape[2], conv.shape[3]
    mh = _interp_matrix(hc, hc * scale_factor)
    mw = _interp_matrix(wc, wc * scale_factor)
    return jnp.einsum("ah,ow,nchw->ncao", mh, mw, conv,
                      precision=jax.lax.Precision.HIGHEST)


if __name__ == "__main__":
    # Small shapes consistent with the module: deconv(input_channel=4, output_channel=8)
    N, CIN, COUT, H, W = 2, 4, 8, 16, 16

    key = jax.random.PRNGKey(0)
    kx, kw, kb = jax.random.split(key, 3)
    x = jax.random.normal(kx, (N, CIN, H, W), dtype=jnp.float32)
    # deterministic synthetic "parameter init" (not a checkpoint load)
    weight = jax.random.normal(kw, (COUT, CIN, 3, 3), dtype=jnp.float32) * 0.1
    bias = jax.random.normal(kb, (COUT,), dtype=jnp.float32) * 0.1

    out = jax.block_until_ready(deconv_forward(x, weight, bias, scale_factor=2))
    assert out.shape == (N, COUT, (H - 2) * 2, (W - 2) * 2), out.shape

    ref = jax.block_until_ready(deconv_reference(x, weight, bias, scale_factor=2))
    max_err = float(jnp.max(jnp.abs(out - ref)))
    # kernel conv uses bf16 operands with f32 accumulation (same as the bf16
    # reference conv); the tolerance leaves headroom for MXU f32 precision-mode
    # differences in the interp matmuls while still catching any layout bug.
    assert jnp.allclose(out, ref, rtol=1e-2, atol=1e-2), max_err
    print("KERNEL_OK")
</pallas_src>

<mosaic_0001>
module attributes {stable_mosaic.version = 11 : i64} {
  func.func @_deconv_kernel(%arg0: i32, %arg1: memref<1x4x256xbf16, #tpu.memory_space<vmem>>, %arg2: memref<9x8x4xbf16, #tpu.memory_space<vmem>>, %arg3: memref<8x1xf32, #tpu.memory_space<vmem>>, %arg4: memref<28x14xf32, #tpu.memory_space<vmem>>, %arg5: memref<14x28xf32, #tpu.memory_space<vmem>>, %arg6: memref<1x8x28x28xf32, #tpu.memory_space<vmem>>, %arg7: memref<8x14x14xf32, #tpu.memory_space<vmem>>) attributes {dimension_semantics = [#tpu.dimension_semantics<parallel>], iteration_bounds = array<i64: 2>, scalar_prefetch = 0 : i64, scratch_operands = 1 : i64, tpu.core_type = #tpu.core_type<tc>, window_params = [{transform_indices = @transform_0, window_bounds = array<i64: 1, 4, 256>}, {pipeline_mode = #tpu.pipeline_mode<synchronous>, transform_indices = @transform_1, window_bounds = array<i64: 9, 8, 4>}, {pipeline_mode = #tpu.pipeline_mode<synchronous>, transform_indices = @transform_2, window_bounds = array<i64: 8, 1>}, {pipeline_mode = #tpu.pipeline_mode<synchronous>, transform_indices = @transform_3, window_bounds = array<i64: 28, 14>}, {pipeline_mode = #tpu.pipeline_mode<synchronous>, transform_indices = @transform_4, window_bounds = array<i64: 14, 28>}, {transform_indices = @transform_5, window_bounds = array<i64: 1, 8, 28, 28>}]} {
    %c0 = arith.constant 0 : index
    %c0_0 = arith.constant 0 : index
    %0 = vector.load %arg3[%c0, %c0_0] : memref<8x1xf32, #tpu.memory_space<vmem>>, vector<8x1xf32>
    %1 = vector.shape_cast %0 : vector<8x1xf32> to vector<8x1xf32>
    %2 = vector.broadcast %1 : vector<8x1xf32> to vector<8x222xf32>
    %c0_1 = arith.constant 0 : index
    %c0_2 = arith.constant 0 : index
    %c0_3 = arith.constant 0 : index
    %3 = vector.load %arg1[%c0_1, %c0_2, %c0_3] : memref<1x4x256xbf16, #tpu.memory_space<vmem>>, vector<1x4x222xbf16>
    %4 = vector.shape_cast %3 : vector<1x4x222xbf16> to vector<4x222xbf16>
    %c0_4 = arith.constant 0 : index
    %c0_5 = arith.constant 0 : index
    %c0_6 = arith.constant 0 : index
    %5 = vector.load %arg2[%c0_4, %c0_5, %c0_6] : memref<9x8x4xbf16, #tpu.memory_space<vmem>>, vector<1x8x4xbf16>
    %6 = vector.shape_cast %5 : vector<1x8x4xbf16> to vector<8x4xbf16>
    %cst = arith.constant dense<0.000000e+00> : vector<8x222xf32>
    %7 = tpu.matmul %6, %4, %cst {dimension_numbers = #tpu.dot_dimension_numbers<[1], [0], [0], [1], [0, 0, 1, 1], [], []>} : vector<8x4xbf16>, vector<4x222xbf16>, vector<8x222xf32> -> vector<8x222xf32>
    %8 = arith.addf %2, %7 : vector<8x222xf32>
    %c0_7 = arith.constant 0 : index
    %c0_8 = arith.constant 0 : index
    %c1 = arith.constant 1 : index
    %9 = vector.load %arg1[%c0_7, %c0_8, %c1] : memref<1x4x256xbf16, #tpu.memory_space<vmem>>, vector<1x4x222xbf16>
    %10 = vector.shape_cast %9 : vector<1x4x222xbf16> to vector<4x222xbf16>
    %c1_9 = arith.constant 1 : index
    %c0_10 = arith.constant 0 : index
    %c0_11 = arith.constant 0 : index
    %11 = vector.load %arg2[%c1_9, %c0_10, %c0_11] : memref<9x8x4xbf16, #tpu.memory_space<vmem>>, vector<1x8x4xbf16>
    %12 = vector.shape_cast %11 : vector<1x8x4xbf16> to vector<8x4xbf16>
    %cst_12 = arith.constant dense<0.000000e+00> : vector<8x222xf32>
    %13 = tpu.matmul %12, %10, %cst_12 {dimension_numbers = #tpu.dot_dimension_numbers<[1], [0], [0], [1], [0, 0, 1, 1], [], []>} : vector<8x4xbf16>, vector<4x222xbf16>, vector<8x222xf32> -> vector<8x222xf32>
    %14 = arith.addf %8, %13 : vector<8x222xf32>
    %c0_13 = arith.constant 0 : index
    %c0_14 = arith.constant 0 : index
    %c2 = arith.constant 2 : index
    %15 = vector.load %arg1[%c0_13, %c0_14, %c2] : memref<1x4x256xbf16, #tpu.memory_space<vmem>>, vector<1x4x222xbf16>
    %16 = vector.shape_cast %15 : vector<1x4x222xbf16> to vector<4x222xbf16>
    %c2_15 = arith.constant 2 : index
    %c0_16 = arith.constant 0 : index
    %c0_17 = arith.constant 0 : index
    %17 = vector.load %arg2[%c2_15, %c0_16, %c0_17] : memref<9x8x4xbf16, #tpu.memory_space<vmem>>, vector<1x8x4xbf16>
    %18 = vector.shape_cast %17 : vector<1x8x4xbf16> to vector<8x4xbf16>
    %cst_18 = arith.constant dense<0.000000e+00> : vector<8x222xf32>
    %19 = tpu.matmul %18, %16, %cst_18 {dimension_numbers = #tpu.dot_dimension_numbers<[1], [0], [0], [1], [0, 0, 1, 1], [], []>} : vector<8x4xbf16>, vector<4x222xbf16>, vector<8x222xf32> -> vector<8x222xf32>
    %20 = arith.addf %14, %19 : vector<8x222xf32>
    %c0_19 = arith.constant 0 : index
    %c0_20 = arith.constant 0 : index
    %c16 = arith.constant 16 : index
    %21 = vector.load %arg1[%c0_19, %c0_20, %c16] : memref<1x4x256xbf16, #tpu.memory_space<vmem>>, vector<1x4x222xbf16>
    %22 = vector.shape_cast %21 : vector<1x4x222xbf16> to vector<4x222xbf16>
    %c3 = arith.constant 3 : index
    %c0_21 = arith.constant 0 : index
    %c0_22 = arith.constant 0 : index
    %23 = vector.load %arg2[%c3, %c0_21, %c0_22] : memref<9x8x4xbf16, #tpu.memory_space<vmem>>, vector<1x8x4xbf16>
    %24 = vector.shape_cast %23 : vector<1x8x4xbf16> to vector<8x4xbf16>
    %cst_23 = arith.constant dense<0.000000e+00> : vector<8x222xf32>
    %25 = tpu.matmul %24, %22, %cst_23 {dimension_numbers = #tpu.dot_dimension_numbers<[1], [0], [0], [1], [0, 0, 1, 1], [], []>} : vector<8x4xbf16>, vector<4x222xbf16>, vector<8x222xf32> -> vector<8x222xf32>
    %26 = arith.addf %20, %25 : vector<8x222xf32>
    %c0_24 = arith.constant 0 : index
    %c0_25 = arith.constant 0 : index
    %c17 = arith.constant 17 : index
    %27 = vector.load %arg1[%c0_24, %c0_25, %c17] : memref<1x4x256xbf16, #tpu.memory_space<vmem>>, vector<1x4x222xbf16>
    %28 = vector.shape_cast %27 : vector<1x4x222xbf16> to vector<4x222xbf16>
    %c4 = arith.constant 4 : index
    %c0_26 = arith.constant 0 : index
    %c0_27 = arith.constant 0 : index
    %29 = vector.load %arg2[%c4, %c0_26, %c0_27] : memref<9x8x4xbf16, #tpu.memory_space<vmem>>, vector<1x8x4xbf16>
    %30 = vector.shape_cast %29 : vector<1x8x4xbf16> to vector<8x4xbf16>
    %cst_28 = arith.constant dense<0.000000e+00> : vector<8x222xf32>
    %31 = tpu.matmul %30, %28, %cst_28 {dimension_numbers = #tpu.dot_dimension_numbers<[1], [0], [0], [1], [0, 0, 1, 1], [], []>} : vector<8x4xbf16>, vector<4x222xbf16>, vector<8x222xf32> -> vector<8x222xf32>
    %32 = arith.addf %26, %31 : vector<8x222xf32>
    %c0_29 = arith.constant 0 : index
    %c0_30 = arith.constant 0 : index
    %c18 = arith.constant 18 : index
    %33 = vector.load %arg1[%c0_29, %c0_30, %c18] : memref<1x4x256xbf16, #tpu.memory_space<vmem>>, vector<1x4x222xbf16>
    %34 = vector.shape_cast %33 : vector<1x4x222xbf16> to vector<4x222xbf16>
    %c5 = arith.constant 5 : index
    %c0_31 = arith.constant 0 : index
    %c0_32 = arith.constant 0 : index
    %35 = vector.load %arg2[%c5, %c0_31, %c0_32] : memref<9x8x4xbf16, #tpu.memory_space<vmem>>, vector<1x8x4xbf16>
    %36 = vector.shape_cast %35 : vector<1x8x4xbf16> to vector<8x4xbf16>
    %cst_33 = arith.constant dense<0.000000e+00> : vector<8x222xf32>
    %37 = tpu.matmul %36, %34, %cst_33 {dimension_numbers = #tpu.dot_dimension_numbers<[1], [0], [0], [1], [0, 0, 1, 1], [], []>} : vector<8x4xbf16>, vector<4x222xbf16>, vector<8x222xf32> -> vector<8x222xf32>
    %38 = arith.addf %32, %37 : vector<8x222xf32>
    %c0_34 = arith.constant 0 : index
    %c0_35 = arith.constant 0 : index
    %c32 = arith.constant 32 : index
    %39 = vector.load %arg1[%c0_34, %c0_35, %c32] : memref<1x4x256xbf16, #tpu.memory_space<vmem>>, vector<1x4x222xbf16>
    %40 = vector.shape_cast %39 : vector<1x4x222xbf16> to vector<4x222xbf16>
    %c6 = arith.constant 6 : index
    %c0_36 = arith.constant 0 : index
    %c0_37 = arith.constant 0 : index
    %41 = vector.load %arg2[%c6, %c0_36, %c0_37] : memref<9x8x4xbf16, #tpu.memory_space<vmem>>, vector<1x8x4xbf16>
    %42 = vector.shape_cast %41 : vector<1x8x4xbf16> to vector<8x4xbf16>
    %cst_38 = arith.constant dense<0.000000e+00> : vector<8x222xf32>
    %43 = tpu.matmul %42, %40, %cst_38 {dimension_numbers = #tpu.dot_dimension_numbers<[1], [0], [0], [1], [0, 0, 1, 1], [], []>} : vector<8x4xbf16>, vector<4x222xbf16>, vector<8x222xf32> -> vector<8x222xf32>
    %44 = arith.addf %38, %43 : vector<8x222xf32>
    %c0_39 = arith.constant 0 : index
    %c0_40 = arith.constant 0 : index
    %c33 = arith.constant 33 : index
    %45 = vector.load %arg1[%c0_39, %c0_40, %c33] : memref<1x4x256xbf16, #tpu.memory_space<vmem>>, vector<1x4x222xbf16>
    %46 = vector.shape_cast %45 : vector<1x4x222xbf16> to vector<4x222xbf16>
    %c7 = arith.constant 7 : index
    %c0_41 = arith.constant 0 : index
    %c0_42 = arith.constant 0 : index
    %47 = vector.load %arg2[%c7, %c0_41, %c0_42] : memref<9x8x4xbf16, #tpu.memory_space<vmem>>, vector<1x8x4xbf16>
    %48 = vector.shape_cast %47 : vector<1x8x4xbf16> to vector<8x4xbf16>
    %cst_43 = arith.constant dense<0.000000e+00> : vector<8x222xf32>
    %49 = tpu.matmul %48, %46, %cst_43 {dimension_numbers = #tpu.dot_dimension_numbers<[1], [0], [0], [1], [0, 0, 1, 1], [], []>} : vector<8x4xbf16>, vector<4x222xbf16>, vector<8x222xf32> -> vector<8x222xf32>
    %50 = arith.addf %44, %49 : vector<8x222xf32>
    %c0_44 = arith.constant 0 : index
    %c0_45 = arith.constant 0 : index
    %c34 = arith.constant 34 : index
    %51 = vector.load %arg1[%c0_44, %c0_45, %c34] : memref<1x4x256xbf16, #tpu.memory_space<vmem>>, vector<1x4x222xbf16>
    %52 = vector.shape_cast %51 : vector<1x4x222xbf16> to vector<4x222xbf16>
    %c8 = arith.constant 8 : index
    %c0_46 = arith.constant 0 : index
    %c0_47 = arith.constant 0 : index
    %53 = vector.load %arg2[%c8, %c0_46, %c0_47] : memref<9x8x4xbf16, #tpu.memory_space<vmem>>, vector<1x8x4xbf16>
    %54 = vector.shape_cast %53 : vector<1x8x4xbf16> to vector<8x4xbf16>
    %cst_48 = arith.constant dense<0.000000e+00> : vector<8x222xf32>
    %55 = tpu.matmul %54, %52, %cst_48 {dimension_numbers = #tpu.dot_dimension_numbers<[1], [0], [0], [1], [0, 0, 1, 1], [], []>} : vector<8x4xbf16>, vector<4x222xbf16>, vector<8x222xf32> -> vector<8x222xf32>
    %56 = arith.addf %50, %55 : vector<8x222xf32>
    %57 = vector.extract_strided_slice %56 {offsets = [0, 0], sizes = [8, 14], strides = [1, 1]} : vector<8x222xf32> to vector<8x14xf32>
    %c0_49 = arith.constant 0 : index
    %c0_50 = arith.constant 0 : index
    %c0_51 = arith.constant 0 : index
    %58 = vector.load %arg7[%c0_49, %c0_50, %c0_51] : memref<8x14x14xf32, #tpu.memory_space<vmem>>, vector<8x1x14xf32>
    %59 = vector.shape_cast %58 : vector<8x1x14xf32> to vector<8x14xf32>
    %60 = vector.shape_cast %57 : vector<8x14xf32> to vector<8x1x14xf32>
    tpu.vector_store %arg7[%c0_49, %c0_50, %c0_51], %60 {strides = array<i32>} : memref<8x14x14xf32, #tpu.memory_space<vmem>>, vector<8x1x14xf32>,
    %61 = vector.extract_strided_slice %56 {offsets = [0, 16], sizes = [8, 14], strides = [1, 1]} : vector<8x222xf32> to vector<8x14xf32>
    %c0_52 = arith.constant 0 : index
    %c1_53 = arith.constant 1 : index
    %c0_54 = arith.constant 0 : index
    %62 = vector.load %arg7[%c0_52, %c1_53, %c0_54] : memref<8x14x14xf32, #tpu.memory_space<vmem>>, vector<8x1x14xf32>
    %63 = vector.shape_cast %62 : vector<8x1x14xf32> to vector<8x14xf32>
    %64 = vector.shape_cast %61 : vector<8x14xf32> to vector<8x1x14xf32>
    tpu.vector_store %arg7[%c0_52, %c1_53, %c0_54], %64 {strides = array<i32>} : memref<8x14x14xf32, #tpu.memory_space<vmem>>, vector<8x1x14xf32>,
    %65 = vector.extract_strided_slice %56 {offsets = [0, 32], sizes = [8, 14], strides = [1, 1]} : vector<8x222xf32> to vector<8x14xf32>
    %c0_55 = arith.constant 0 : index
    %c2_56 = arith.constant 2 : index
    %c0_57 = arith.constant 0 : index
    %66 = vector.load %arg7[%c0_55, %c2_56, %c0_57] : memref<8x14x14xf32, #tpu.memory_space<vmem>>, vector<8x1x14xf32>
    %67 = vector.shape_cast %66 : vector<8x1x14xf32> to vector<8x14xf32>
    %68 = vector.shape_cast %65 : vector<8x14xf32> to vector<8x1x14xf32>
    tpu.vector_store %arg7[%c0_55, %c2_56, %c0_57], %68 {strides = array<i32>} : memref<8x14x14xf32, #tpu.memory_space<vmem>>, vector<8x1x14xf32>,
    %69 = vector.extract_strided_slice %56 {offsets = [0, 48], sizes = [8, 14], strides = [1, 1]} : vector<8x222xf32> to vector<8x14xf32>
    %c0_58 = arith.constant 0 : index
    %c3_59 = arith.constant 3 : index
    %c0_60 = arith.constant 0 : index
    %70 = vector.load %arg7[%c0_58, %c3_59, %c0_60] : memref<8x14x14xf32, #tpu.memory_space<vmem>>, vector<8x1x14xf32>
    %71 = vector.shape_cast %70 : vector<8x1x14xf32> to vector<8x14xf32>
    %72 = vector.shape_cast %69 : vector<8x14xf32> to vector<8x1x14xf32>
    tpu.vector_store %arg7[%c0_58, %c3_59, %c0_60], %72 {strides = array<i32>} : memref<8x14x14xf32, #tpu.memory_space<vmem>>, vector<8x1x14xf32>,
    %73 = vector.extract_strided_slice %56 {offsets = [0, 64], sizes = [8, 14], strides = [1, 1]} : vector<8x222xf32> to vector<8x14xf32>
    %c0_61 = arith.constant 0 : index
    %c4_62 = arith.constant 4 : index
    %c0_63 = arith.constant 0 : index
    %74 = vector.load %arg7[%c0_61, %c4_62, %c0_63] : memref<8x14x14xf32, #tpu.memory_space<vmem>>, vector<8x1x14xf32>
    %75 = vector.shape_cast %74 : vector<8x1x14xf32> to vector<8x14xf32>
    %76 = vector.shape_cast %73 : vector<8x14xf32> to vector<8x1x14xf32>
    tpu.vector_store %arg7[%c0_61, %c4_62, %c0_63], %76 {strides = array<i32>} : memref<8x14x14xf32, #tpu.memory_space<vmem>>, vector<8x1x14xf32>,
    %77 = vector.extract_strided_slice %56 {offsets = [0, 80], sizes = [8, 14], strides = [1, 1]} : vector<8x222xf32> to vector<8x14xf32>
    %c0_64 = arith.constant 0 : index
    %c5_65 = arith.constant 5 : index
    %c0_66 = arith.constant 0 : index
    %78 = vector.load %arg7[%c0_64, %c5_65, %c0_66] : memref<8x14x14xf32, #tpu.memory_space<vmem>>, vector<8x1x14xf32>
    %79 = vector.shape_cast %78 : vector<8x1x14xf32> to vector<8x14xf32>
    %80 = vector.shape_cast %77 : vector<8x14xf32> to vector<8x1x14xf32>
    tpu.vector_store %arg7[%c0_64, %c5_65, %c0_66], %80 {strides = array<i32>} : memref<8x14x14xf32, #tpu.memory_space<vmem>>, vector<8x1x14xf32>,
    %81 = vector.extract_strided_slice %56 {offsets = [0, 96], sizes = [8, 14], strides = [1, 1]} : vector<8x222xf32> to vector<8x14xf32>
    %c0_67 = arith.constant 0 : index
    %c6_68 = arith.constant 6 : index
    %c0_69 = arith.constant 0 : index
    %82 = vector.load %arg7[%c0_67, %c6_68, %c0_69] : memref<8x14x14xf32, #tpu.memory_space<vmem>>, vector<8x1x14xf32>
    %83 = vector.shape_cast %82 : vector<8x1x14xf32> to vector<8x14xf32>
    %84 = vector.shape_cast %81 : vector<8x14xf32> to vector<8x1x14xf32>
    tpu.vector_store %arg7[%c0_67, %c6_68, %c0_69], %84 {strides = array<i32>} : memref<8x14x14xf32, #tpu.memory_space<vmem>>, vector<8x1x14xf32>,
    %85 = vector.extract_strided_slice %56 {offsets = [0, 112], sizes = [8, 14], strides = [1, 1]} : vector<8x222xf32> to vector<8x14xf32>
    %c0_70 = arith.constant 0 : index
    %c7_71 = arith.constant 7 : index
    %c0_72 = arith.constant 0 : index
    %86 = vector.load %arg7[%c0_70, %c7_71, %c0_72] : memref<8x14x14xf32, #tpu.memory_space<vmem>>, vector<8x1x14xf32>
    %87 = vector.shape_cast %86 : vector<8x1x14xf32> to vector<8x14xf32>
    %88 = vector.shape_cast %85 : vector<8x14xf32> to vector<8x1x14xf32>
    tpu.vector_store %arg7[%c0_70, %c7_71, %c0_72], %88 {strides = array<i32>} : memref<8x14x14xf32, #tpu.memory_space<vmem>>, vector<8x1x14xf32>,
    %89 = vector.extract_strided_slice %56 {offsets = [0, 128], sizes = [8, 14], strides = [1, 1]} : vector<8x222xf32> to vector<8x14xf32>
    %c0_73 = arith.constant 0 : index
    %c8_74 = arith.constant 8 : index
    %c0_75 = arith.constant 0 : index
    %90 = vector.load %arg7[%c0_73, %c8_74, %c0_75] : memref<8x14x14xf32, #tpu.memory_space<vmem>>, vector<8x1x14xf32>
    %91 = vector.shape_cast %90 : vector<8x1x14xf32> to vector<8x14xf32>
    %92 = vector.shape_cast %89 : vector<8x14xf32> to vector<8x1x14xf32>
    tpu.vector_store %arg7[%c0_73, %c8_74, %c0_75], %92 {strides = array<i32>} : memref<8x14x14xf32, #tpu.memory_space<vmem>>, vector<8x1x14xf32>,
    %93 = vector.extract_strided_slice %56 {offsets = [0, 144], sizes = [8, 14], strides = [1, 1]} : vector<8x222xf32> to vector<8x14xf32>
    %c0_76 = arith.constant 0 : index
    %c9 = arith.constant 9 : index
    %c0_77 = arith.constant 0 : index
    %94 = vector.load %arg7[%c0_76, %c9, %c0_77] : memref<8x14x14xf32, #tpu.memory_space<vmem>>, vector<8x1x14xf32>
    %95 = vector.shape_cast %94 : vector<8x1x14xf32> to vector<8x14xf32>
    %96 = vector.shape_cast %93 : vector<8x14xf32> to vector<8x1x14xf32>
    tpu.vector_store %arg7[%c0_76, %c9, %c0_77], %96 {strides = array<i32>} : memref<8x14x14xf32, #tpu.memory_space<vmem>>, vector<8x1x14xf32>,
    %97 = vector.extract_strided_slice %56 {offsets = [0, 160], sizes = [8, 14], strides = [1, 1]} : vector<8x222xf32> to vector<8x14xf32>
    %c0_78 = arith.constant 0 : index
    %c10 = arith.constant 10 : index
    %c0_79 = arith.constant 0 : index
    %98 = vector.load %arg7[%c0_78, %c10, %c0_79] : memref<8x14x14xf32, #tpu.memory_space<vmem>>, vector<8x1x14xf32>
    %99 = vector.shape_cast %98 : vector<8x1x14xf32> to vector<8x14xf32>
    %100 = vector.shape_cast %97 : vector<8x14xf32> to vector<8x1x14xf32>
    tpu.vector_store %arg7[%c0_78, %c10, %c0_79], %100 {strides = array<i32>} : memref<8x14x14xf32, #tpu.memory_space<vmem>>, vector<8x1x14xf32>,
    %101 = vector.extract_strided_slice %56 {offsets = [0, 176], sizes = [8, 14], strides = [1, 1]} : vector<8x222xf32> to vector<8x14xf32>
    %c0_80 = arith.constant 0 : index
    %c11 = arith.constant 11 : index
    %c0_81 = arith.constant 0 : index
    %102 = vector.load %arg7[%c0_80, %c11, %c0_81] : memref<8x14x14xf32, #tpu.memory_space<vmem>>, vector<8x1x14xf32>
    %103 = vector.shape_cast %102 : vector<8x1x14xf32> to vector<8x14xf32>
    %104 = vector.shape_cast %101 : vector<8x14xf32> to vector<8x1x14xf32>
    tpu.vector_store %arg7[%c0_80, %c11, %c0_81], %104 {strides = array<i32>} : memref<8x14x14xf32, #tpu.memory_space<vmem>>, vector<8x1x14xf32>,
    %105 = vector.extract_strided_slice %56 {offsets = [0, 192], sizes = [8, 14], strides = [1, 1]} : vector<8x222xf32> to vector<8x14xf32>
    %c0_82 = arith.constant 0 : index
    %c12 = arith.constant 12 : index
    %c0_83 = arith.constant 0 : index
    %106 = vector.load %arg7[%c0_82, %c12, %c0_83] : memref<8x14x14xf32, #tpu.memory_space<vmem>>, vector<8x1x14xf32>
    %107 = vector.shape_cast %106 : vector<8x1x14xf32> to vector<8x14xf32>
    %108 = vector.shape_cast %105 : vector<8x14xf32> to vector<8x1x14xf32>
    tpu.vector_store %arg7[%c0_82, %c12, %c0_83], %108 {strides = array<i32>} : memref<8x14x14xf32, #tpu.memory_space<vmem>>, vector<8x1x14xf32>,
    %109 = vector.extract_strided_slice %56 {offsets = [0, 208], sizes = [8, 14], strides = [1, 1]} : vector<8x222xf32> to vector<8x14xf32>
    %c0_84 = arith.constant 0 : index
    %c13 = arith.constant 13 : index
    %c0_85 = arith.constant 0 : index
    %110 = vector.load %arg7[%c0_84, %c13, %c0_85] : memref<8x14x14xf32, #tpu.memory_space<vmem>>, vector<8x1x14xf32>
    %111 = vector.shape_cast %110 : vector<8x1x14xf32> to vector<8x14xf32>
    %112 = vector.shape_cast %109 : vector<8x14xf32> to vector<8x1x14xf32>
    tpu.vector_store %arg7[%c0_84, %c13, %c0_85], %112 {strides = array<i32>} : memref<8x14x14xf32, #tpu.memory_space<vmem>>, vector<8x1x14xf32>,
    %c0_86 = arith.constant 0 : index
    %c0_87 = arith.constant 0 : index
    %c0_88 = arith.constant 0 : index
    %113 = vector.load %arg7[%c0_86, %c0_87, %c0_88] : memref<8x14x14xf32, #tpu.memory_space<vmem>>, vector<8x14x14xf32>
    %c0_89 = arith.constant 0 : index
    %c0_90 = arith.constant 0 : index
    %114 = vector.load %arg5[%c0_89, %c0_90] : memref<14x28xf32, #tpu.memory_space<vmem>>, vector<14x28xf32>
    %115 = vector.shape_cast %114 : vector<14x28xf32> to vector<1x14x28xf32>
    %116 = vector.broadcast %115 : vector<1x14x28xf32> to vector<8x14x28xf32>
    %cst_91 = arith.constant dense<0.000000e+00> : vector<8x14x28xf32>
    %117 = tpu.matmul %113, %116, %cst_91 {dimension_numbers = #tpu.dot_dimension_numbers<[2], [1], [1], [2], [0, 0, 0, 1, 1, 2], [0], [0]>} : vector<8x14x14xf32>, vector<8x14x28xf32>, vector<8x14x28xf32> -> vector<8x14x28xf32>
    %c0_92 = arith.constant 0 : index
    %c0_93 = arith.constant 0 : index
    %118 = vector.load %arg4[%c0_92, %c0_93] : memref<28x14xf32, #tpu.memory_space<vmem>>, vector<28x14xf32>
    %119 = vector.shape_cast %118 : vector<28x14xf32> to vector<1x28x14xf32>
    %120 = vector.broadcast %119 : vector<1x28x14xf32> to vector<8x28x14xf32>
    %cst_94 = arith.constant dense<0.000000e+00> : vector<8x28x28xf32>
    %121 = tpu.matmul %120, %117, %cst_94 {dimension_numbers = #tpu.dot_dimension_numbers<[2], [1], [1], [2], [0, 0, 0, 1, 1, 2], [0], [0]>} : vector<8x28x14xf32>, vector<8x14x28xf32>, vector<8x28x28xf32> -> vector<8x28x28xf32>
    %c0_95 = arith.constant 0 : index
    %c0_96 = arith.constant 0 : index
    %c0_97 = arith.constant 0 : index
    %c0_98 = arith.constant 0 : index
    %122 = vector.load %arg6[%c0_95, %c0_96, %c0_97, %c0_98] : memref<1x8x28x28xf32, #tpu.memory_space<vmem>>, vector<1x8x28x28xf32>
    %123 = vector.shape_cast %122 : vector<1x8x28x28xf32> to vector<8x28x28xf32>
    %124 = vector.shape_cast %121 : vector<8x28x28xf32> to vector<1x8x28x28xf32>
    tpu.vector_store %arg6[%c0_95, %c0_96, %c0_97, %c0_98], %124 {strides = array<i32>} : memref<1x8x28x28xf32, #tpu.memory_space<vmem>>, vector<1x8x28x28xf32>,
    return
  }
  func.func @transform_0(%arg0: i32) -> (i32, i32, i32) {
    %c0_i32 = arith.constant 0 : i32
    %c0_i32_0 = arith.constant 0 : i32
    %c0_i32_1 = arith.constant 0 : i32
    return %arg0, %c0_i32, %c0_i32_0 : i32, i32, i32
  }
  func.func @transform_1(%arg0: i32) -> (i32, i32, i32) {
    %c0_i32 = arith.constant 0 : i32
    %c0_i32_0 = arith.constant 0 : i32
    %c0_i32_1 = arith.constant 0 : i32
    %c0_i32_2 = arith.constant 0 : i32
    return %c0_i32, %c0_i32_0, %c0_i32_1 : i32, i32, i32
  }
  func.func @transform_2(%arg0: i32) -> (i32, i32) {
    %c0_i32 = arith.constant 0 : i32
    %c0_i32_0 = arith.constant 0 : i32
    %c0_i32_1 = arith.constant 0 : i32
    return %c0_i32, %c0_i32_0 : i32, i32
  }
  func.func @transform_3(%arg0: i32) -> (i32, i32) {
    %c0_i32 = arith.constant 0 : i32
    %c0_i32_0 = arith.constant 0 : i32
    %c0_i32_1 = arith.constant 0 : i32
    return %c0_i32, %c0_i32_0 : i32, i32
  }
  func.func @transform_4(%arg0: i32) -> (i32, i32) {
    %c0_i32 = arith.constant 0 : i32
    %c0_i32_0 = arith.constant 0 : i32
    %c0_i32_1 = arith.constant 0 : i32
    return %c0_i32, %c0_i32_0 : i32, i32
  }
  func.func @transform_5(%arg0: i32) -> (i32, i32, i32, i32) {
    %c0_i32 = arith.constant 0 : i32
    %c0_i32_0 = arith.constant 0 : i32
    %c0_i32_1 = arith.constant 0 : i32
    %c0_i32_2 = arith.constant 0 : i32
    return %arg0, %c0_i32, %c0_i32_0, %c0_i32_1 : i32, i32, i32, i32
  }
}

</mosaic_0001>

<bundles_post_ra>
// kernel: deconv_forward.1
= control target key start
LH: loop header
LB: loop body
LE: loop exit
PB: predicated region body
PF: predicated region fallthrough
CT: control target
= control target key end

     0   :  { %s3457_s18 = smov 0   ;;  %s4131_s0 = inlined_call_operand.vmem [shape: bf16[2,4,256], index: 0, kind: input, shape index: {}]   ;;  %s4132_s1 = inlined_call_operand.vmem [shape: bf16[9,8,4], index: 1, kind: input, shape index: {}]   ;;  %s4133_s2 = inlined_call_operand.vmem [shape: f32[8,1], index: 2, kind: input, shape index: {}]   ;;  %s4134_s3 = inlined_call_operand.vmem [shape: f32[28,14], index: 3, kind: input, shape index: {}]   ;;  %s4135_s4 = inlined_call_operand.vmem [shape: f32[14,28], index: 4, kind: input, shape index: {}]   ;;  %s4136_s5 = inlined_call_operand.vmem [shape: f32[2,8,28,28], index: 5, kind: output, shape index: {}]  }
   0x1 LB: > { %s2918_s19 = sadd.s32 4294967295, %s3409_s18   ;;  %p2922_p0 = scmp.ge.s32.totalorder %s3409_s18, 1  ;;  %s3409_s18 = sphi %s3457_s18, %s15_s18  }
   0x2   : > { %p187_p1 = scmp.lt.s32.totalorder %s3409_s18, 3 }
   0x4   : > { %p188_p2 = pnand %p2922_p0, %p187_p1 }
   0x5   : > { %p215_p3 = scmp.lt.s32.totalorder (!%p188_p2), %s2918_s19, 1  ;;  %v3411_v0 = vmov (!%p188_p2), 0   ;;  %vm247_vm0 = vcmask (!%p188_p2), 1041408   ;;  %s3412_s24 = smov (!%p188_p2), 127   ;;  %v233_v4 = vld [vmem:[%s4132_s1] sm:$0xf] (!%p188_p2)  ;;  %v862_v48 = vlaneseq (!%p188_p2) }
   0x6   : > { %191 = sbr.rel (%p188_p2) target bundleno = 1199 (0x4af), region = 40  ;;  %286 = vmatprep.mubr.bf16.mxu0 (!%p188_p2), %v3411_v0  ;;  %3402 = vset.pattern.permute.xlu0 (!%p188_p2), %v3411_v0  ;;  %s3413_s25 = smov (!%p188_p2), 126   ;;  %vm243_vm1 = vcmask (!%p188_p2), 31744   ;;  %v226_v5 = vld [vmem:[%s4133_s2] sm:$0xff] (!%p188_p2)  ;;  %vm313_vm2 = vcmask (!%p188_p2), 1039360   ;;  %vm383_vm3 = vcmask (!%p188_p2), 1031168  }
   0x7   : > { %s3414_s28 = smov (!%p188_p2), 112   ;;  %s3415_s29 = smov (!%p188_p2), 111   ;;  %v2930_v13 = vld [vmem:[%s4132_s1 + $0x4] sm:$0xf] (!%p188_p2)  ;;  %vm453_vm4 = vcmask (!%p188_p2), 916480   ;;  %vm523_vm5 = vcmask (!%p188_p2), 908288  }
   0x8   : > { %s3416_s30 = smov (!%p188_p2), 110   ;;  %s3417_s6 = smov (!%p188_p2), 96   ;;  %v2934_v18 = vld [vmem:[%s4132_s1 + $0x8] sm:$0xf] (!%p188_p2)  ;;  %v2938_v23 = vld [vmem:[%s4132_s1 + $0xc] sm:$0xf] (!%p188_p2) }
   0x9   : > { %s3418_s7 = smov (!%p188_p2), 95   ;;  %s3419_s8 = smov (!%p188_p2), 94   ;;  %vm593_vm6 = vcmask (!%p188_p2), 900096   ;;  %v2942_v28 = vld [vmem:[%s4132_s1 + $0x10] sm:$0xf] (!%p188_p2)  ;;  %vm663_vm7 = vcmask (!%p188_p2), 785408  }
   0xa   : > { %v2946_v33 = vld [vmem:[%s4132_s1 + $0x14] sm:$0xf] (!%p188_p2)  ;;  %vm733_vm8 = vcmask (!%p188_p2), 777216   ;;  %v2950_v38 = vld [vmem:[%s4132_s1 + $0x18] sm:$0xf] (!%p188_p2)  ;;  %vm803_vm9 = vcmask (!%p188_p2), 769024  }
   0xb   : > { %v2954_v43 = vld [vmem:[%s4132_s1 + $0x1c] sm:$0xf] (!%p188_p2)  ;;  %v2958_v45 = vld [vmem:[%s4132_s1 + $0x20] sm:$0xf] (!%p188_p2)  ;;  %v3420_v46 = vmov (!%p188_p2), 1966171168  }
   0xc   : > { %v860_v47 = vunpack.c.l.s4 (!%p188_p2), %v3420_v46  ;;  %v863_v50 = vshrl.u32 (!%p188_p2), %v862_v48, 7  ;;  %vm915_vm10 = vcmask (!%p188_p2), 106496   ;;  %s3424_s9 = smov (!%p188_p2), 64   ;;  %s3425_s10 = smov (!%p188_p2), 32   ;;  %vm1463_vm11 = vcmask (!%p188_p2), 1045504  }
   0xd   : > { %s4140_s19 = smov (!%p215_p3, %s2918_s19), 1  ;;  %vm3426_vm12 = vmmov 1   ;;  %vm1456_vm14 = vcmask 113664   ;;  %vm2829_vm15 = vcmask 228352  }
   0xe   : > { %s3028_s20 = sshll.u32 %s4140_s19, 2  ;;  %v861_v49 = vunpack.c.0.s8 %v860_v47  ;;  %v3542_v61 = vsub.s32 0, %v863_v50  ;;  %vm3624_vm13 = vmpackc.low %vm1463_vm11, %vm3426_vm12 }
   0xf   : > { %s219_s23 = scalar_lea.vmem %s4131_s0, %s3028_s20 }
  0x10   : > { %v2931_v1 = vld.sshfl [vmem:[%s219_s23] sm:$0x33 pattern:$0x76325410]  ;;  %v864_v52 = vsub.s32 %v861_v49, %v863_v50  ;;  %s3029_s23 = sshll.u32 %s4140_s19, 8 }
  0x11   : > { %309 = vrot.lane.b32.xlu0 %v2931_v1, %s3412_s24  ;;  %v308_v2 = vcombine.high %v2931_v1, %v2931_v1  ;;  %379 = vrot.lane.b32.xlu1 %v2931_v1, %s3413_s25  ;;  %v249_v3 = vsel %vm247_vm0, %v2931_v1, 0  ;;  %s4062_s26 = scalar_lea.vmem %s4136_s5, %s3029_s23 }
  0x13   : > { %2928 = vmatprep.subr.msk.bf16.mxu0 %vm247_vm0, %v308_v2 }
  0x14   : > { %255 = vmatpush1.bf16.msra.mxu0 %v249_v3 }
  0x15   : > { %311 = vrot.lane.b32.xlu0 %v308_v2, %s3412_s24  ;;  %381 = vrot.lane.b32.xlu1 %v308_v2, %s3413_s25 }
  0x17   : > { %2929 = vmatmul.mubr.msk.bf16.vlgmr.msra.gmra.mrb[0].mxu0 %vm243_vm1, %v233_v4 }
  0x18   : > { %356 = vmatprep.mubr.bf16.mxu0 %v3411_v0 }
  0x19   : > { %451 = vrot.lane.b32.xlu1 %v308_v2, %s3414_s28  ;;  %449 = vrot.lane.b32.xlu0 %v2931_v1, %s3414_s28 }
  0x1d   : > { %521 = vrot.lane.b32.xlu1 %v308_v2, %s3415_s29  ;;  %519 = vrot.lane.b32.xlu0 %v2931_v1, %s3415_s29 }
  0x21   : > { %591 = vrot.lane.b32.xlu1 %v308_v2, %s3416_s30  ;;  %589 = vrot.lane.b32.xlu0 %v2931_v1, %s3416_s30  ;;  %s3421_s30 = smov 80  }
  0x25   : > { %661 = vrot.lane.b32.xlu1 %v308_v2, %s3417_s6  ;;  %659 = vrot.lane.b32.xlu0 %v2931_v1, %s3417_s6 }
  0x29   : > { %731 = vrot.lane.b32.xlu1 %v308_v2, %s3418_s7  ;;  %729 = vrot.lane.b32.xlu0 %v2931_v1, %s3418_s7  ;;  %s3422_s7 = smov 48  }
  0x2d   : > { %801 = vrot.lane.b32.xlu1 %v308_v2, %s3419_s8  ;;  %799 = vrot.lane.b32.xlu0 %v2931_v1, %s3419_s8  ;;  %s3423_s8 = smov 16  }
  0x31   : > { %229 = vperm.xlu0 %3402, %v226_v5  }
  0x83   : > { %v310_v6 = vpop.permute.xlu0 %309  ;;  %v380_v7 = vpop.permute.xlu1 %379 }
  0x87   : > { %v312_v8 = vpop.permute.xlu0 %311  ;;  %v382_v9 = vpop.permute.xlu1 %381 }
  0x88   : > { %v314_v10 = vsel %vm313_vm2, %v310_v6, %v312_v8  ;;  %2932 = vmatprep.subr.msk.bf16.mxu0 %vm247_vm0, %v312_v8  ;;  %v384_v11 = vsel %vm383_vm3, %v380_v7, %v382_v9 }
  0x89   : > { %v319_v12 = vsel %vm247_vm0, %v314_v10, 0  ;;  %v389_v14 = vsel %vm247_vm0, %v384_v11, 0 }
  0x8a   : > { %325 = vmatpush1.bf16.msra.mxu0 %v319_v12 }
  0x8b   : > { %2936 = vmatprep.subr.msk.bf16.mxu0 %vm247_vm0, %v382_v9  ;;  %v452_v15 = vpop.permute.xlu1 %451  ;;  %v450_v16 = vpop.permute.xlu0 %449 }
  0x8c   : > { %v454_v17 = vsel %vm453_vm4, %v450_v16, %v452_v15 }
  0x8d   : > { %2933 = vmatmul.mubr.msk.bf16.vlgmr.msra.gmra.mrb[0].mxu0 %vm243_vm1, %v2930_v13  ;;  %v459_v19 = vsel %vm247_vm0, %v454_v17, 0 }
  0x8e   : > { %395 = vmatpush1.bf16.msra.mxu0 %v389_v14  ;;  %426 = vmatprep.mubr.bf16.mxu0 %v3411_v0 }
  0x8f   : > { %2940 = vmatprep.subr.msk.bf16.mxu0 %vm247_vm0, %v452_v15  ;;  %v522_v20 = vpop.permute.xlu1 %521  ;;  %v520_v21 = vpop.permute.xlu0 %519 }
  0x90   : > { %v524_v22 = vsel %vm523_vm5, %v520_v21, %v522_v20 }
  0x91   : > { %v529_v24 = vsel %vm247_vm0, %v524_v22, 0 }
  0x93   : > { %v592_v25 = vpop.permute.xlu1 %591  ;;  %v590_v26 = vpop.permute.xlu0 %589 }
  0x94   : > { %v594_v27 = vsel %vm593_vm6, %v590_v26, %v592_v25 }
  0x95   : > { %v599_v29 = vsel %vm247_vm0, %v594_v27, 0 }
  0x97   : > { %v662_v30 = vpop.permute.xlu1 %661  ;;  %v660_v31 = vpop.permute.xlu0 %659 }
  0x98   : > { %v664_v32 = vsel %vm663_vm7, %v660_v31, %v662_v30 }
  0x99   : > { %2937 = vmatmul.mubr.msk.bf16.vlgmr.msra.gmra.mrb[0].mxu0 %vm243_vm1, %v2934_v18  ;;  %v669_v34 = vsel %vm247_vm0, %v664_v32, 0 }
  0x9a   : > { %465 = vmatpush1.bf16.msra.mxu0 %v459_v19  ;;  %496 = vmatprep.mubr.bf16.mxu0 %v3411_v0 }
  0x9b   : > { %2944 = vmatprep.subr.msk.bf16.mxu0 %vm247_vm0, %v522_v20  ;;  %v732_v35 = vpop.permute.xlu1 %731  ;;  %v730_v36 = vpop.permute.xlu0 %729 }
  0x9c   : > { %v734_v37 = vsel %vm733_vm8, %v730_v36, %v732_v35  ;;  %v1455_v36 = vld [vmem:[%s4135_s4 + $0x8] sm:$0x3f] }
  0x9d   : > { %v739_v39 = vsel %vm247_vm0, %v734_v37, 0 }
  0x9f   : > { %v802_v40 = vpop.permute.xlu1 %801  ;;  %v800_v41 = vpop.permute.xlu0 %799 }
  0xa0   : > { %v804_v42 = vsel %vm803_vm9, %v800_v41, %v802_v40 }
  0xa1   : > { %v809_v44 = vsel %vm247_vm0, %v804_v42, 0 }
  0xa5   : > { %2941 = vmatmul.mubr.msk.bf16.vlgmr.msra.gmra.mrb[0].mxu0 %vm243_vm1, %v2938_v23 }
  0xa6   : > { %535 = vmatpush1.bf16.msra.mxu0 %v529_v24  ;;  %566 = vmatprep.mubr.bf16.mxu0 %v3411_v0 }
  0xa7   : > { %2948 = vmatprep.subr.msk.bf16.mxu0 %vm247_vm0, %v592_v25 }
  0xb0   : > { %v230_v51 = vpop.permute.xlu0 %229 }
  0xb1   : > { %2945 = vmatmul.mubr.msk.bf16.vlgmr.msra.gmra.mrb[0].mxu0 %vm243_vm1, %v2942_v28 }
  0xb2   : > { %605 = vmatpush1.bf16.msra.mxu0 %v599_v29  ;;  %636 = vmatprep.mubr.bf16.mxu0 %v3411_v0 }
  0xb3   : > { %2952 = vmatprep.subr.msk.bf16.mxu0 %vm247_vm0, %v662_v30 }
  0xbd   : > { %2949 = vmatmul.mubr.msk.bf16.vlgmr.msra.gmra.mrb[0].mxu0 %vm243_vm1, %v2946_v33 }
  0xbe   : > { %675 = vmatpush1.bf16.msra.mxu0 %v669_v34  ;;  %706 = vmatprep.mubr.bf16.mxu0 %v3411_v0 }
  0xbf   : > { %2956 = vmatprep.subr.msk.bf16.mxu0 %vm247_vm0, %v732_v35  ;;  %v1454_v35 = vld [vmem:[%s4135_s4] sm:$0xff] }
  0xc0   : > { %v3621_v37 = vpack.c.bf16 %v1455_v36, %v1454_v35 }
  0xc2   : > { %3248 = vmatprep.subr.msk.bf16.mxu1 %vm3624_vm13, %v3621_v37 }
  0xc3   : > { %3251 = vmatpush3.bf16.msk.msra.mxu1 %vm3624_vm13, %v3621_v37 }
  0xc4   : > { %3254 = vmatprep.subr.msk.bf16.mxu1 %vm3624_vm13, %v3621_v37 }
  0xc9   : > { %2953 = vmatmul.mubr.msk.bf16.vlgmr.msra.gmra.mrb[0].mxu0 %vm243_vm1, %v2950_v38 }
  0xca   : > { %745 = vmatpush1.bf16.msra.mxu0 %v739_v39  ;;  %776 = vmatprep.mubr.bf16.mxu0 %v3411_v0 }
  0xcb   : > { %2960 = vmatprep.subr.msk.bf16.mxu0 %vm247_vm0, %v802_v40  ;;  %vm2833_vm0 = vcmask 224256  }
  0xd5   : > { %2957 = vmatmul.mubr.msk.bf16.vlgmr.msra.gmra.mrb[0].mxu0 %vm243_vm1, %v2954_v43 }
  0xd6   : > { %815 = vmatpush1.bf16.msra.mxu0 %v809_v44  ;;  %846 = vmatprep.mubr.bf16.mxu0 %v3411_v0 }
  0xe1   : > { %2961 = vmatmul.mubr.msk.bf16.vlgmr.msra.gmra.mrb[0].mxu0 %vm243_vm1, %v2958_v45 }
 0x1b4   : > { %v848_v53 = vpop.f32.mrb[0].mxu0 }
 0x1b5   : > { %v3344_v54 = vadd.f32 %v848_v53, %v230_v51  ;;  %v850_v55 = vpop.f32.mrb[1].mxu0 }
 0x1b6   : > { %v3345_v56 = vadd.f32 %v850_v55, %v230_v51  ;;  %v852_v57 = vpop.f32.mrb[2].mxu0 }
 0x1b7   : > { %v858_v58 = vcombine.high %v3344_v54, %v3344_v54  ;;  %v865_v59 = vrot.slane %v3344_v54, %v864_v52  ;;  %v853_v60 = vpop.f32.mrb[3].mxu0 }
 0x1b8   : > { %v1181_v62 = vcombine.high %v3345_v56, %v3345_v56  ;;  %v1188_v63 = vrot.slane %v3345_v56, %v864_v52 }
 0x1b9   : > { %v872_v0 = vrot.slane %v858_v58, %v864_v52  ;;  %v873_v1 = vcombine.high %v865_v59, %v865_v59  ;;  %v881_v2 = vrot.slane %v865_v59, %v864_v52 }
 0x1ba   : > { %v1195_v3 = vrot.slane %v1181_v62, %v864_v52  ;;  %v1196_v4 = vcombine.high %v1188_v63, %v1188_v63  ;;  %v1204_v5 = vrot.slane %v1188_v63, %v864_v52 }
 0x1bb   : > { %v874_v6 = vcombine.high %v872_v0, %v872_v0  ;;  %v3544_v7 = vrot.slane %v872_v0, %v864_v52  ;;  %v3546_v8 = vrot.slane %v873_v1, %v864_v52  ;;  %v3548_v9 = vcombine.high %v881_v2, %v881_v2  ;;  %916 = vst.msk [vmem:[#allocation2] sm:$0x1] %vm915_vm10, %v881_v2 }
 0x1bc   : > { %v927_v10 = vrot.slane %v881_v2, %v3542_v61  ;;  %v1197_v11 = vcombine.high %v1195_v3, %v1195_v3  ;;  %v1211_v12 = vrot.slane %v1195_v3, %v864_v52  ;;  %v1218_v13 = vrot.slane %v1196_v4, %v864_v52  ;;  %1238 = vst.msk [vmem:[#allocation2 + $0x8] sm:$0x1] %vm915_vm10, %v1204_v5 }
 0x1bd   : > { %v902_v14 = vrot.slane %v874_v6, %v864_v52  ;;  %v904_v15 = vcombine.high %v3544_v7, %v3544_v7  ;;  %v905_v16 = vcombine.high %v3546_v8, %v3546_v8  ;;  %917 = vst.msk [vmem:[#allocation2 + $0x10] sm:$0x1] %vm915_vm10, %v3546_v8  ;;  %918 = vst.msk [vmem:[#allocation2 + $0x20] sm:$0x1] %vm915_vm10, %v3548_v9 }
 0x1be   : > { %920 = vst.msk [vmem:[#allocation2 + $0x40] sm:$0x1] %vm915_vm10, %v3544_v7  ;;  %v1225_v17 = vrot.slane %v1197_v11, %v864_v52  ;;  %v1226_v18 = vcombine.high %v1204_v5, %v1204_v5  ;;  %1239 = vst.msk [vmem:[#allocation2 + $0x18] sm:$0x1] %vm915_vm10, %v1218_v13  ;;  %1020 = vrot.lane.b32.xlu0 %v927_v10, %s3421_s30  ;;  %956 = vrot.lane.b32.xlu1 %v927_v10, %s3414_s28 }
 0x1bf   : > { %1242 = vst.msk [vmem:[#allocation2 + $0x48] sm:$0x1] %vm915_vm10, %v1211_v12  ;;  %v906_v19 = vcombine.high %v902_v14, %v902_v14  ;;  %919 = vst.msk [vmem:[#allocation2 + $0x30] sm:$0x1] %vm915_vm10, %v905_v16  ;;  %v3570_v20 = vrot.slane %v905_v16, %v3542_v61  ;;  %v3573_v21 = vrot.slane %v902_v14, %v3542_v61 }
 0x1c0   : > { %921 = vst.msk [vmem:[#allocation2 + $0x50] sm:$0x1] %vm915_vm10, %v902_v14  ;;  %922 = vst.msk [vmem:[#allocation2 + $0x60] sm:$0x1] %vm915_vm10, %v904_v15  ;;  %v3576_v22 = vrot.slane %v904_v15, %v3542_v61  ;;  %v1227_v23 = vcombine.high %v1211_v12, %v1211_v12  ;;  %v1228_v24 = vcombine.high %v1218_v13, %v1218_v13 }
 0x1c1   : > { %v1229_v25 = vcombine.high %v1225_v17, %v1225_v17  ;;  %1240 = vst.msk [vmem:[#allocation2 + $0x28] sm:$0x1] %vm915_vm10, %v1226_v18  ;;  %1243 = vst.msk [vmem:[#allocation2 + $0x58] sm:$0x1] %vm915_vm10, %v1225_v17  ;;  %v3583_v26 = vrot.slane %v906_v19, %v3542_v61  ;;  %v1253_v27 = vrot.slane %v1218_v13, %v3542_v61 }
 0x1c2   : > { %923 = vst.msk [vmem:[#allocation2 + $0x70] sm:$0x1] %vm915_vm10, %v906_v19  ;;  %v3587_v28 = vrot.slane %v1226_v18, %v3542_v61  ;;  %v3590_v29 = vrot.slane %v1211_v12, %v3542_v61  ;;  %1241 = vst.msk [vmem:[#allocation2 + $0x38] sm:$0x1] %vm915_vm10, %v1228_v24  ;;  %1084 = vrot.lane.b32.xlu0 %v927_v10, %s3422_s7  ;;  %v3597_v30 = vrot.slane %v1228_v24, %v3542_v61 }
 0x1c3   : > { %1244 = vst.msk [vmem:[#allocation2 + $0x68] sm:$0x1] %vm915_vm10, %v1227_v23  ;;  %1245 = vst.msk [vmem:[#allocation2 + $0x78] sm:$0x1] %vm915_vm10, %v1229_v25  ;;  %v3600_v31 = vrot.slane %v1225_v17, %v3542_v61  ;;  %v3603_v32 = vrot.slane %v1227_v23, %v3542_v61  ;;  %v3606_v33 = vrot.slane %v1229_v25, %v3542_v61  ;;  %988 = vrot.lane.b32.xlu1 %v927_v10, %s3417_s6 }
 0x1c4   : > { %v1249_v34 = vrot.slane %v1204_v5, %v3542_v61  ;;  %v931_v39 = vrot.slane %v3546_v8, %v3542_v61  ;;  %v935_v40 = vrot.slane %v3548_v9, %v3542_v61  ;;  %v943_v41 = vrot.slane %v3544_v7, %v3542_v61 }
 0x1c6   : > { %1148 = vrot.lane.b32.xlu0 %v927_v10, %s3423_s8 }
 0x1c7   : > { %1052 = vrot.lane.b32.xlu1 %v927_v10, %s3424_s9 }
 0x1ca   : > { %1310 = vrot.lane.b32.xlu0 %v1249_v34, %s3417_s6 }
 0x1cb   : > { %1116 = vrot.lane.b32.xlu1 %v927_v10, %s3425_s10 }
 0x1ce   : > { %1374 = vrot.lane.b32.xlu0 %v1249_v34, %s3424_s9 }
 0x1cf   : > { %1278 = vrot.lane.b32.xlu1 %v1249_v34, %s3414_s28 }
 0x1d2   : > { %958 = vrot.lane.b32.xlu0 %v931_v39, %s3414_s28 }
 0x1d3   : > { %1342 = vrot.lane.b32.xlu1 %v1249_v34, %s3421_s30 }
 0x1d6   : > { %1022 = vrot.lane.b32.xlu0 %v931_v39, %s3421_s30 }
 0x1d7   : > { %1406 = vrot.lane.b32.xlu1 %v1249_v34, %s3422_s7 }
 0x1da   : > { %1086 = vrot.lane.b32.xlu0 %v931_v39, %s3422_s7 }
 0x1db   : > { %990 = vrot.lane.b32.xlu1 %v931_v39, %s3417_s6 }
 0x1de   : > { %1150 = vrot.lane.b32.xlu0 %v931_v39, %s3423_s8 }
 0x1df   : > { %1054 = vrot.lane.b32.xlu1 %v931_v39, %s3424_s9 }
 0x1e2   : > { %960 = vrot.lane.b32.xlu0 %v935_v40, %s3414_s28 }
 0x1e3   : > { %1118 = vrot.lane.b32.xlu1 %v931_v39, %s3425_s10 }
 0x1e6   : > { %1024 = vrot.lane.b32.xlu0 %v935_v40, %s3421_s30 }
 0x1e7   : > { %992 = vrot.lane.b32.xlu1 %v935_v40, %s3417_s6 }
 0x1ea   : > { %1088 = vrot.lane.b32.xlu0 %v935_v40, %s3422_s7 }
 0x1eb   : > { %1056 = vrot.lane.b32.xlu1 %v935_v40, %s3424_s9 }
 0x1ee   : > { %1152 = vrot.lane.b32.xlu0 %v935_v40, %s3423_s8 }
 0x1ef   : > { %1120 = vrot.lane.b32.xlu1 %v935_v40, %s3425_s10 }
 0x1f2   : > { %964 = vrot.lane.b32.xlu0 %v943_v41, %s3414_s28 }
 0x1f3   : > { %996 = vrot.lane.b32.xlu1 %v943_v41, %s3417_s6 }
 0x1f6   : > { %1028 = vrot.lane.b32.xlu0 %v943_v41, %s3421_s30 }
 0x1f7   : > { %1060 = vrot.lane.b32.xlu1 %v943_v41, %s3424_s9 }
 0x1fa   : > { %1092 = vrot.lane.b32.xlu0 %v943_v41, %s3422_s7 }
 0x1fb   : > { %1124 = vrot.lane.b32.xlu1 %v943_v41, %s3425_s10 }
 0x1fe   : > { %1156 = vrot.lane.b32.xlu0 %v943_v41, %s3423_s8 }
 0x1ff   : > { %1280 = vrot.lane.b32.xlu1 %v1253_v27, %s3414_s28 }
 0x202   : > { %1312 = vrot.lane.b32.xlu0 %v1253_v27, %s3417_s6 }
 0x203   : > { %1344 = vrot.lane.b32.xlu1 %v1253_v27, %s3421_s30 }
 0x206   : > { %1376 = vrot.lane.b32.xlu0 %v1253_v27, %s3424_s9 }
 0x207   : > { %1408 = vrot.lane.b32.xlu1 %v1253_v27, %s3422_s7 }
 0x20a   : > { %1314 = vrot.lane.b32.xlu0 %v3587_v28, %s3417_s6 }
 0x20b   : > { %1282 = vrot.lane.b32.xlu1 %v3587_v28, %s3414_s28 }
 0x20e   : > { %1378 = vrot.lane.b32.xlu0 %v3587_v28, %s3424_s9 }
 0x20f   : > { %1346 = vrot.lane.b32.xlu1 %v3587_v28, %s3421_s30 }
 0x212   : > { %1318 = vrot.lane.b32.xlu0 %v3590_v29, %s3417_s6 }
 0x213   : > { %1410 = vrot.lane.b32.xlu1 %v3587_v28, %s3422_s7 }
 0x216   : > { %1382 = vrot.lane.b32.xlu0 %v3590_v29, %s3424_s9 }
 0x217   : > { %1286 = vrot.lane.b32.xlu1 %v3590_v29, %s3414_s28 }
 0x21a   : > { %962 = vrot.lane.b32.xlu0 %v3570_v20, %s3414_s28 }
 0x21b   : > { %1350 = vrot.lane.b32.xlu1 %v3590_v29, %s3421_s30 }
 0x21e   : > { %1026 = vrot.lane.b32.xlu0 %v3570_v20, %s3421_s30 }
 0x21f   : > { %1414 = vrot.lane.b32.xlu1 %v3590_v29, %s3422_s7 }
 0x222   : > { %1090 = vrot.lane.b32.xlu0 %v3570_v20, %s3422_s7 }
 0x223   : > { %994 = vrot.lane.b32.xlu1 %v3570_v20, %s3417_s6 }
 0x226   : > { %1154 = vrot.lane.b32.xlu0 %v3570_v20, %s3423_s8 }
 0x227   : > { %1058 = vrot.lane.b32.xlu1 %v3570_v20, %s3424_s9 }
 0x22a   : > { %966 = vrot.lane.b32.xlu0 %v3573_v21, %s3414_s28 }
 0x22b   : > { %1122 = vrot.lane.b32.xlu1 %v3570_v20, %s3425_s10 }
 0x22e   : > { %1030 = vrot.lane.b32.xlu0 %v3573_v21, %s3421_s30 }
 0x22f   : > { %998 = vrot.lane.b32.xlu1 %v3573_v21, %s3417_s6 }
 0x230   : > { %v1021_v42 = vpop.permute.xlu0 %1020  ;;  %v957_v43 = vpop.permute.xlu1 %956 }
 0x231   : > { %1044 = vst.msk [vmem:[#allocation2 + $0x3] sm:$0x1] %vm915_vm10, %v1021_v42  ;;  %980 = vst.msk [vmem:[#allocation2 + $0x1] sm:$0x1] %vm915_vm10, %v957_v43 }
 0x232   : > { %1094 = vrot.lane.b32.xlu0 %v3573_v21, %s3422_s7 }
 0x233   : > { %1062 = vrot.lane.b32.xlu1 %v3573_v21, %s3424_s9 }
 0x234   : > { %v1085_v44 = vpop.permute.xlu0 %1084 }
 0x235   : > { %1108 = vst.msk [vmem:[#allocation2 + $0x5] sm:$0x1] %vm915_vm10, %v1085_v44  ;;  %v989_v45 = vpop.permute.xlu1 %988 }
 0x236   : > { %1012 = vst.msk [vmem:[#allocation2 + $0x2] sm:$0x1] %vm915_vm10, %v989_v45  ;;  %1158 = vrot.lane.b32.xlu0 %v3573_v21, %s3423_s8 }
 0x237   : > { %1126 = vrot.lane.b32.xlu1 %v3573_v21, %s3425_s10 }
 0x238   : > { %v1149_v46 = vpop.permute.xlu0 %1148 }
 0x239   : > { %1172 = vst.msk [vmem:[#allocation2 + $0x7] sm:$0x1] %vm915_vm10, %v1149_v46  ;;  %v1053_v47 = vpop.permute.xlu1 %1052 }
 0x23a   : > { %1076 = vst.msk [vmem:[#allocation2 + $0x4] sm:$0x1] %vm915_vm10, %v1053_v47  ;;  %968 = vrot.lane.b32.xlu0 %v3576_v22, %s3414_s28 }
 0x23b   : > { %1000 = vrot.lane.b32.xlu1 %v3576_v22, %s3417_s6 }
 0x23c   : > { %v1311_v48 = vpop.permute.xlu0 %1310 }
 0x23d   : > { %v1117_v49 = vpop.permute.xlu1 %1116  ;;  %1334 = vst.msk [vmem:[#allocation2 + $0xa] sm:$0x1] %vm915_vm10, %v1311_v48 }
 0x23e   : > { %1140 = vst.msk [vmem:[#allocation2 + $0x6] sm:$0x1] %vm915_vm10, %v1117_v49  ;;  %1032 = vrot.lane.b32.xlu0 %v3576_v22, %s3421_s30 }
 0x23f   : > { %1064 = vrot.lane.b32.xlu1 %v3576_v22, %s3424_s9 }
 0x240   : > { %v1375_v50 = vpop.permute.xlu0 %1374 }
 0x241   : > { %1398 = vst.msk [vmem:[#allocation2 + $0xc] sm:$0x1] %vm915_vm10, %v1375_v50  ;;  %v1279_v51 = vpop.permute.xlu1 %1278 }
 0x242   : > { %1302 = vst.msk [vmem:[#allocation2 + $0x9] sm:$0x1] %vm915_vm10, %v1279_v51  ;;  %1096 = vrot.lane.b32.xlu0 %v3576_v22, %s3422_s7 }
 0x243   : > { %1128 = vrot.lane.b32.xlu1 %v3576_v22, %s3425_s10 }
 0x244   : > { %v959_v52 = vpop.permute.xlu0 %958 }
 0x245   : > { %981 = vst.msk [vmem:[#allocation2 + $0x11] sm:$0x1] %vm915_vm10, %v959_v52  ;;  %v1343_v53 = vpop.permute.xlu1 %1342  ;;  %v1438_v54 = vld [vmem:[#allocation2] sm:$0xff] }
 0x246   : > { %1366 = vst.msk [vmem:[#allocation2 + $0xb] sm:$0x1] %vm915_vm10, %v1343_v53  ;;  %3114 = vmatprep.mubr.msk.f32.mxu1 %vm1456_vm14, %v1438_v54  ;;  %1160 = vrot.lane.b32.xlu0 %v3576_v22, %s3423_s8 }
 0x247   : > { %1284 = vrot.lane.b32.xlu1 %v3597_v30, %s3414_s28 }
 0x248   : > { %v1023_v55 = vpop.permute.xlu0 %1022 }
 0x249   : > { %1045 = vst.msk [vmem:[#allocation2 + $0x13] sm:$0x1] %vm915_vm10, %v1023_v55  ;;  %v1407_v56 = vpop.permute.xlu1 %1406 }
 0x24a   : > { %1430 = vst.msk [vmem:[#allocation2 + $0xd] sm:$0x1] %vm915_vm10, %v1407_v56  ;;  %1316 = vrot.lane.b32.xlu0 %v3597_v30, %s3417_s6 }
 0x24b   : > { %1348 = vrot.lane.b32.xlu1 %v3597_v30, %s3421_s30 }
 0x24c   : > { %v1087_v57 = vpop.permute.xlu0 %1086 }
 0x24d   : > { %1109 = vst.msk [vmem:[#allocation2 + $0x15] sm:$0x1] %vm915_vm10, %v1087_v57  ;;  %v991_v58 = vpop.permute.xlu1 %990 }
 0x24e   : > { %1013 = vst.msk [vmem:[#allocation2 + $0x12] sm:$0x1] %vm915_vm10, %v991_v58  ;;  %1380 = vrot.lane.b32.xlu0 %v3597_v30, %s3424_s9 }
 0x24f   : > { %1412 = vrot.lane.b32.xlu1 %v3597_v30, %s3422_s7 }
 0x250   : > { %v1151_v59 = vpop.permute.xlu0 %1150 }
 0x251   : > { %1173 = vst.msk [vmem:[#allocation2 + $0x17] sm:$0x1] %vm915_vm10, %v1151_v59  ;;  %v1055_v60 = vpop.permute.xlu1 %1054  ;;  %v1439_v61 = vld [vmem:[#allocation2 + $0x8] sm:$0x3f] }
 0x252   : > { %1077 = vst.msk [vmem:[#allocation2 + $0x14] sm:$0x1] %vm915_vm10, %v1055_v60  ;;  %3115 = vmatmul.mubr.msk.f32.vlgmr.msra.gmra.mrb[0].mxu1 %vm1456_vm14, %v1439_v61  ;;  %1320 = vrot.lane.b32.xlu0 %v3600_v31, %s3417_s6 }
 0x253   : > { %1288 = vrot.lane.b32.xlu1 %v3600_v31, %s3414_s28  ;;  %3257 = vmatpush3.bf16.msk.msra.mxu1 %vm3624_vm13, %v3621_v37 }
 0x254   : > { %v961_v62 = vpop.permute.xlu0 %960  ;;  %3260 = vmatprep.subr.msk.bf16.mxu1 %vm3624_vm13, %v3621_v37 }
 0x255   : > { %982 = vst.msk [vmem:[#allocation2 + $0x21] sm:$0x1] %vm915_vm10, %v961_v62  ;;  %v1119_v63 = vpop.permute.xlu1 %1118 }
 0x256   : > { %1141 = vst.msk [vmem:[#allocation2 + $0x16] sm:$0x1] %vm915_vm10, %v1119_v63  ;;  %1384 = vrot.lane.b32.xlu0 %v3600_v31, %s3424_s9 }
 0x257   : > { %1352 = vrot.lane.b32.xlu1 %v3600_v31, %s3421_s30 }
 0x258   : > { %v1025_v0 = vpop.permute.xlu0 %1024 }
 0x259   : > { %1046 = vst.msk [vmem:[#allocation2 + $0x23] sm:$0x1] %vm915_vm10, %v1025_v0  ;;  %v993_v1 = vpop.permute.xlu1 %992 }
 0x25a   : > { %1014 = vst.msk [vmem:[#allocation2 + $0x22] sm:$0x1] %vm915_vm10, %v993_v1  ;;  %1322 = vrot.lane.b32.xlu0 %v3603_v32, %s3417_s6 }
 0x25b   : > { %1416 = vrot.lane.b32.xlu1 %v3600_v31, %s3422_s7 }
 0x25c   : > { %v1089_v2 = vpop.permute.xlu0 %1088 }
 0x25d   : > { %1110 = vst.msk [vmem:[#allocation2 + $0x25] sm:$0x1] %vm915_vm10, %v1089_v2  ;;  %v1057_v3 = vpop.permute.xlu1 %1056  ;;  %v1440_v4 = vld [vmem:[#allocation2 + $0x10] sm:$0xff] }
 0x25e   : > { %1078 = vst.msk [vmem:[#allocation2 + $0x24] sm:$0x1] %vm915_vm10, %v1057_v3  ;;  %3121 = vmatprep.mubr.msk.f32.mxu1 %vm1456_vm14, %v1440_v4  ;;  %1386 = vrot.lane.b32.xlu0 %v3603_v32, %s3424_s9 }
 0x25f   : > { %1290 = vrot.lane.b32.xlu1 %v3603_v32, %s3414_s28 }
 0x260   : > { %v1153_v5 = vpop.permute.xlu0 %1152 }
 0x261   : > { %1174 = vst.msk [vmem:[#allocation2 + $0x27] sm:$0x1] %vm915_vm10, %v1153_v5  ;;  %v1121_v6 = vpop.permute.xlu1 %1120 }
 0x262   : > { %1142 = vst.msk [vmem:[#allocation2 + $0x26] sm:$0x1] %vm915_vm10, %v1121_v6  ;;  %970 = vrot.lane.b32.xlu0 %v3583_v26, %s3414_s28 }
 0x263   : > { %1354 = vrot.lane.b32.xlu1 %v3603_v32, %s3421_s30 }
 0x264   : > { %v965_v7 = vpop.permute.xlu0 %964 }
 0x265   : > { %984 = vst.msk [vmem:[#allocation2 + $0x41] sm:$0x1] %vm915_vm10, %v965_v7  ;;  %v997_v8 = vpop.permute.xlu1 %996 }
 0x266   : > { %1016 = vst.msk [vmem:[#allocation2 + $0x42] sm:$0x1] %vm915_vm10, %v997_v8  ;;  %1034 = vrot.lane.b32.xlu0 %v3583_v26, %s3421_s30 }
 0x267   : > { %1418 = vrot.lane.b32.xlu1 %v3603_v32, %s3422_s7 }
 0x268   : > { %v1029_v9 = vpop.permute.xlu0 %1028 }
 0x269   : > { %1048 = vst.msk [vmem:[#allocation2 + $0x43] sm:$0x1] %vm915_vm10, %v1029_v9  ;;  %v1061_v10 = vpop.permute.xlu1 %1060  ;;  %v1442_v24 = vld [vmem:[#allocation2 + $0x20] sm:$0xff] }
 0x26a   : > { %1080 = vst.msk [vmem:[#allocation2 + $0x44] sm:$0x1] %vm915_vm10, %v1061_v10  ;;  %1098 = vrot.lane.b32.xlu0 %v3583_v26, %s3422_s7 }
 0x26b   : > { %1002 = vrot.lane.b32.xlu1 %v3583_v26, %s3417_s6 }
 0x26c   : > { %v1093_v11 = vpop.permute.xlu0 %1092 }
 0x26d   : > { %1112 = vst.msk [vmem:[#allocation2 + $0x45] sm:$0x1] %vm915_vm10, %v1093_v11  ;;  %v1125_v12 = vpop.permute.xlu1 %1124 }
 0x26e   : > { %1144 = vst.msk [vmem:[#allocation2 + $0x46] sm:$0x1] %vm915_vm10, %v1125_v12  ;;  %1162 = vrot.lane.b32.xlu0 %v3583_v26, %s3423_s8 }
 0x26f   : > { %1066 = vrot.lane.b32.xlu1 %v3583_v26, %s3424_s9 }
 0x270   : > { %v1157_v13 = vpop.permute.xlu0 %1156 }
 0x271   : > { %1176 = vst.msk [vmem:[#allocation2 + $0x47] sm:$0x1] %vm915_vm10, %v1157_v13  ;;  %v1281_v14 = vpop.permute.xlu1 %1280  ;;  %v3920_v13 = vld [vmem:[%s4134_s3] sm:$0xff] }
 0x272   : > { %1303 = vst.msk [vmem:[#allocation2 + $0x19] sm:$0x1] %vm915_vm10, %v1281_v14  ;;  %1324 = vrot.lane.b32.xlu0 %v3606_v33, %s3417_s6  ;;  %3220 = vmatprep.mubr.msk.f32.mxu0 %vm1456_vm14, %v3920_v13 }
 0x273   : > { %1130 = vrot.lane.b32.xlu1 %v3583_v26, %s3425_s10 }
 0x274   : > { %v1313_v15 = vpop.permute.xlu0 %1312 }
 0x275   : > { %1335 = vst.msk [vmem:[#allocation2 + $0x1a] sm:$0x1] %vm915_vm10, %v1313_v15  ;;  %v1345_v16 = vpop.permute.xlu1 %1344 }
 0x276   : > { %1367 = vst.msk [vmem:[#allocation2 + $0x1b] sm:$0x1] %vm915_vm10, %v1345_v16  ;;  %1388 = vrot.lane.b32.xlu0 %v3606_v33, %s3424_s9 }
 0x277   : > { %1292 = vrot.lane.b32.xlu1 %v3606_v33, %s3414_s28 }
 0x278   : > { %v1377_v17 = vpop.permute.xlu0 %1376  ;;  %v1446_v2 = vld [vmem:[#allocation2 + $0x40] sm:$0xff] }
 0x279   : > { %1399 = vst.msk [vmem:[#allocation2 + $0x1c] sm:$0x1] %vm915_vm10, %v1377_v17  ;;  %v1409_v18 = vpop.permute.xlu1 %1408 }
 0x27a   : > { %1431 = vst.msk [vmem:[#allocation2 + $0x1d] sm:$0x1] %vm915_vm10, %v1409_v18 }
 0x27b   : > { %1356 = vrot.lane.b32.xlu1 %v3606_v33, %s3421_s30 }
 0x27c   : > { %v1315_v19 = vpop.permute.xlu0 %1314 }
 0x27d   : > { %1336 = vst.msk [vmem:[#allocation2 + $0x2a] sm:$0x1] %vm915_vm10, %v1315_v19  ;;  %v1283_v20 = vpop.permute.xlu1 %1282 }
 0x27e   : > { %1304 = vst.msk [vmem:[#allocation2 + $0x29] sm:$0x1] %vm915_vm10, %v1283_v20 }
 0x27f   : > { %1420 = vrot.lane.b32.xlu1 %v3606_v33, %s3422_s7 }
 0x280   : > { %v1379_v21 = vpop.permute.xlu0 %1378 }
 0x281   : > { %1400 = vst.msk [vmem:[#allocation2 + $0x2c] sm:$0x1] %vm915_vm10, %v1379_v21  ;;  %v1347_v22 = vpop.permute.xlu1 %1346  ;;  %v1441_v23 = vld [vmem:[#allocation2 + $0x18] sm:$0x3f] }
 0x282   : > { %1368 = vst.msk [vmem:[#allocation2 + $0x2b] sm:$0x1] %vm915_vm10, %v1347_v22  ;;  %3122 = vmatmul.mubr.msk.f32.vlgmr.msra.gmra.mrb[2].mxu1 %vm1456_vm14, %v1441_v23 }
 0x283   : > { %3128 = vmatprep.mubr.msk.f32.mxu1 %vm1456_vm14, %v1442_v24  ;;  %3263 = vmatpush3.bf16.msk.msra.mxu1 %vm3624_vm13, %v3621_v37 }
 0x284   : > { %v1319_v25 = vpop.permute.xlu0 %1318  ;;  %3266 = vmatprep.subr.msk.bf16.mxu1 %vm3624_vm13, %v3621_v37 }
 0x285   : > { %v1411_v26 = vpop.permute.xlu1 %1410  ;;  %1338 = vst.msk [vmem:[#allocation2 + $0x4a] sm:$0x1] %vm915_vm10, %v1319_v25 }
 0x286   : > { %1432 = vst.msk [vmem:[#allocation2 + $0x2d] sm:$0x1] %vm915_vm10, %v1411_v26 }
 0x288   : > { %v1383_v27 = vpop.permute.xlu0 %1382 }
 0x289   : > { %1402 = vst.msk [vmem:[#allocation2 + $0x4c] sm:$0x1] %vm915_vm10, %v1383_v27  ;;  %v1287_v28 = vpop.permute.xlu1 %1286 }
 0x28a   : > { %1306 = vst.msk [vmem:[#allocation2 + $0x49] sm:$0x1] %vm915_vm10, %v1287_v28 }
 0x28c   : > { %v963_v29 = vpop.permute.xlu0 %962 }
 0x28d   : > { %983 = vst.msk [vmem:[#allocation2 + $0x31] sm:$0x1] %vm915_vm10, %v963_v29  ;;  %v1351_v30 = vpop.permute.xlu1 %1350  ;;  %v1443_v31 = vld [vmem:[#allocation2 + $0x28] sm:$0x3f] }
 0x28e   : > { %1370 = vst.msk [vmem:[#allocation2 + $0x4b] sm:$0x1] %vm915_vm10, %v1351_v30  ;;  %3129 = vmatmul.mubr.msk.f32.vlgmr.msra.gmra.mrb[4].mxu1 %vm1456_vm14, %v1443_v31  ;;  %v3954_v31 = vld [vmem:[%s4134_s3 + $0x8] sm:$0xff] }
 0x28f   : > { %3269 = vmatpush3.bf16.msk.msra.mxu1 %vm3624_vm13, %v3621_v37 }
 0x290   : > { %v1027_v32 = vpop.permute.xlu0 %1026  ;;  %3272 = vmatprep.subr.msk.bf16.mxu1 %vm3624_vm13, %v3621_v37 }
 0x291   : > { %1047 = vst.msk [vmem:[#allocation2 + $0x33] sm:$0x1] %vm915_vm10, %v1027_v32  ;;  %v1415_v33 = vpop.permute.xlu1 %1414  ;;  %v3959_v32 = vld [vmem:[%s4134_s3 + $0x10] sm:$0xff] }
 0x292   : > { %1434 = vst.msk [vmem:[#allocation2 + $0x4d] sm:$0x1] %vm915_vm10, %v1415_v33  ;;  %v3968_v33 = vld [vmem:[%s4134_s3 + $0x18] sm:$0xf] }
 0x294   : > { %v1091_v34 = vpop.permute.xlu0 %1090 }
 0x295   : > { %1111 = vst.msk [vmem:[#allocation2 + $0x35] sm:$0x1] %vm915_vm10, %v1091_v34  ;;  %v995_v35 = vpop.permute.xlu1 %994 }
 0x296   : > { %1015 = vst.msk [vmem:[#allocation2 + $0x32] sm:$0x1] %vm915_vm10, %v995_v35 }
 0x298   : > { %v1155_v36 = vpop.permute.xlu0 %1154 }
 0x299   : > { %1175 = vst.msk [vmem:[#allocation2 + $0x37] sm:$0x1] %vm915_vm10, %v1155_v36  ;;  %v1059_v39 = vpop.permute.xlu1 %1058  ;;  %v1447_v5 = vld [vmem:[#allocation2 + $0x48] sm:$0x3f] }
 0x29a   : > { %1079 = vst.msk [vmem:[#allocation2 + $0x34] sm:$0x1] %vm915_vm10, %v1059_v39 }
 0x29c   : > { %v967_v40 = vpop.permute.xlu0 %966 }
 0x29d   : > { %985 = vst.msk [vmem:[#allocation2 + $0x51] sm:$0x1] %vm915_vm10, %v967_v40  ;;  %v1123_v41 = vpop.permute.xlu1 %1122 }
 0x29e   : > { %1143 = vst.msk [vmem:[#allocation2 + $0x36] sm:$0x1] %vm915_vm10, %v1123_v41 }
 0x2a0   : > { %v1031_v42 = vpop.permute.xlu0 %1030 }
 0x2a1   : > { %1049 = vst.msk [vmem:[#allocation2 + $0x53] sm:$0x1] %vm915_vm10, %v1031_v42  ;;  %v999_v43 = vpop.permute.xlu1 %998 }
 0x2a2   : > { %1017 = vst.msk [vmem:[#allocation2 + $0x52] sm:$0x1] %vm915_vm10, %v999_v43 }
 0x2a4   : > { %v1095_v44 = vpop.permute.xlu0 %1094 }
 0x2a5   : > { %1113 = vst.msk [vmem:[#allocation2 + $0x55] sm:$0x1] %vm915_vm10, %v1095_v44  ;;  %v1063_v45 = vpop.permute.xlu1 %1062  ;;  %v1444_v46 = vld [vmem:[#allocation2 + $0x30] sm:$0xff] }
 0x2a6   : > { %1081 = vst.msk [vmem:[#allocation2 + $0x54] sm:$0x1] %vm915_vm10, %v1063_v45  ;;  %3135 = vmatprep.mubr.msk.f32.mxu1 %vm1456_vm14, %v1444_v46 }
 0x2a8   : > { %v1159_v47 = vpop.permute.xlu0 %1158 }
 0x2a9   : > { %1177 = vst.msk [vmem:[#allocation2 + $0x57] sm:$0x1] %vm915_vm10, %v1159_v47  ;;  %v1127_v48 = vpop.permute.xlu1 %1126 }
 0x2aa   : > { %1145 = vst.msk [vmem:[#allocation2 + $0x56] sm:$0x1] %vm915_vm10, %v1127_v48 }
 0x2ac   : > { %v969_v49 = vpop.permute.xlu0 %968 }
 0x2ad   : > { %986 = vst.msk [vmem:[#allocation2 + $0x61] sm:$0x1] %vm915_vm10, %v969_v49  ;;  %v1001_v50 = vpop.permute.xlu1 %1000 }
 0x2ae   : > { %1018 = vst.msk [vmem:[#allocation2 + $0x62] sm:$0x1] %vm915_vm10, %v1001_v50 }
 0x2b0   : > { %v1033_v51 = vpop.permute.xlu0 %1032 }
 0x2b1   : > { %1050 = vst.msk [vmem:[#allocation2 + $0x63] sm:$0x1] %vm915_vm10, %v1033_v51  ;;  %v1065_v52 = vpop.permute.xlu1 %1064  ;;  %v1448_v6 = vld [vmem:[#allocation2 + $0x50] sm:$0xff] }
 0x2b2   : > { %1082 = vst.msk [vmem:[#allocation2 + $0x64] sm:$0x1] %vm915_vm10, %v1065_v52 }
 0x2b4   : > { %v1097_v53 = vpop.permute.xlu0 %1096 }
 0x2b5   : > { %1114 = vst.msk [vmem:[#allocation2 + $0x65] sm:$0x1] %vm915_vm10, %v1097_v53  ;;  %v1129_v54 = vpop.permute.xlu1 %1128 }
 0x2b6   : > { %1146 = vst.msk [vmem:[#allocation2 + $0x66] sm:$0x1] %vm915_vm10, %v1129_v54 }
 0x2b8   : > { %v1161_v55 = vpop.permute.xlu0 %1160 }
 0x2b9   : > { %1178 = vst.msk [vmem:[#allocation2 + $0x67] sm:$0x1] %vm915_vm10, %v1161_v55  ;;  %v1285_v56 = vpop.permute.xlu1 %1284 }
 0x2ba   : > { %1305 = vst.msk [vmem:[#allocation2 + $0x39] sm:$0x1] %vm915_vm10, %v1285_v56 }
 0x2bc   : > { %v1317_v57 = vpop.permute.xlu0 %1316 }
 0x2bd   : > { %1337 = vst.msk [vmem:[#allocation2 + $0x3a] sm:$0x1] %vm915_vm10, %v1317_v57  ;;  %v1349_v58 = vpop.permute.xlu1 %1348 }
 0x2be   : > { %1369 = vst.msk [vmem:[#allocation2 + $0x3b] sm:$0x1] %vm915_vm10, %v1349_v58 }
 0x2c0   : > { %v1381_v59 = vpop.permute.xlu0 %1380  ;;  %v1450_v12 = vld [vmem:[#allocation2 + $0x60] sm:$0xff] }
 0x2c1   : > { %1401 = vst.msk [vmem:[#allocation2 + $0x3c] sm:$0x1] %vm915_vm10, %v1381_v59  ;;  %v1413_v60 = vpop.permute.xlu1 %1412 }
 0x2c2   : > { %1433 = vst.msk [vmem:[#allocation2 + $0x3d] sm:$0x1] %vm915_vm10, %v1413_v60 }
 0x2c4   : > { %v1321_v61 = vpop.permute.xlu0 %1320 }
 0x2c5   : > { %1339 = vst.msk [vmem:[#allocation2 + $0x5a] sm:$0x1] %vm915_vm10, %v1321_v61  ;;  %v1289_v62 = vpop.permute.xlu1 %1288 }
 0x2c6   : > { %1307 = vst.msk [vmem:[#allocation2 + $0x59] sm:$0x1] %vm915_vm10, %v1289_v62 }
 0x2c8   : > { %v1385_v63 = vpop.permute.xlu0 %1384 }
 0x2c9   : > { %1403 = vst.msk [vmem:[#allocation2 + $0x5c] sm:$0x1] %vm915_vm10, %v1385_v63  ;;  %v1353_v0 = vpop.permute.xlu1 %1352  ;;  %v1445_v1 = vld [vmem:[#allocation2 + $0x38] sm:$0x3f] }
 0x2ca   : > { %1371 = vst.msk [vmem:[#allocation2 + $0x5b] sm:$0x1] %vm915_vm10, %v1353_v0  ;;  %3136 = vmatmul.mubr.msk.f32.vlgmr.msra.gmra.mrb[6].mxu1 %vm1456_vm14, %v1445_v1 }
 0x2cb   : > { %3275 = vmatpush3.bf16.msk.msra.mxu1 %vm3624_vm13, %v3621_v37  ;;  %3142 = vmatprep.mubr.msk.f32.mxu1 %vm1456_vm14, %v1446_v2 }
 0x2cc   : > { %v1323_v3 = vpop.permute.xlu0 %1322  ;;  %3278 = vmatprep.subr.msk.bf16.mxu1 %vm3624_vm13, %v3621_v37 }
 0x2cd   : > { %1340 = vst.msk [vmem:[#allocation2 + $0x6a] sm:$0x1] %vm915_vm10, %v1323_v3  ;;  %v1417_v4 = vpop.permute.xlu1 %1416 }
 0x2ce   : > { %1435 = vst.msk [vmem:[#allocation2 + $0x5d] sm:$0x1] %vm915_vm10, %v1417_v4  ;;  %3143 = vmatmul.mubr.msk.f32.vlgmr.msra.gmra.mrb[8].mxu1 %vm1456_vm14, %v1447_v5 }
 0x2cf   : > { %3149 = vmatprep.mubr.msk.f32.mxu1 %vm1456_vm14, %v1448_v6  ;;  %3281 = vmatpush3.bf16.msk.msra.mxu1 %vm3624_vm13, %v3621_v37 }
 0x2d0   : > { %v1387_v7 = vpop.permute.xlu0 %1386  ;;  %3284 = vmatprep.subr.msk.bf16.mxu1 %vm3624_vm13, %v3621_v37 }
 0x2d1   : > { %1404 = vst.msk [vmem:[#allocation2 + $0x6c] sm:$0x1] %vm915_vm10, %v1387_v7  ;;  %v1291_v8 = vpop.permute.xlu1 %1290 }
 0x2d2   : > { %1308 = vst.msk [vmem:[#allocation2 + $0x69] sm:$0x1] %vm915_vm10, %v1291_v8 }
 0x2d4   : > { %v971_v9 = vpop.permute.xlu0 %970 }
 0x2d5   : > { %987 = vst.msk [vmem:[#allocation2 + $0x71] sm:$0x1] %vm915_vm10, %v971_v9  ;;  %v1355_v10 = vpop.permute.xlu1 %1354  ;;  %v1449_v11 = vld [vmem:[#allocation2 + $0x58] sm:$0x3f] }
 0x2d6   : > { %1372 = vst.msk [vmem:[#allocation2 + $0x6b] sm:$0x1] %vm915_vm10, %v1355_v10  ;;  %3150 = vmatmul.mubr.msk.f32.vlgmr.msra.gmra.mrb[10].mxu1 %vm1456_vm14, %v1449_v11 }
 0x2d7   : > { %3156 = vmatprep.mubr.msk.f32.mxu1 %vm1456_vm14, %v1450_v12  ;;  %3287 = vmatpush3.bf16.msk.msra.mxu1 %vm3624_vm13, %v3621_v37 }
 0x2d8   : > { %v1035_v14 = vpop.permute.xlu0 %1034  ;;  %3290 = vmatprep.subr.msk.bf16.mxu1 %vm3624_vm13, %v3621_v37 }
 0x2d9   : > { %1051 = vst.msk [vmem:[#allocation2 + $0x73] sm:$0x1] %vm915_vm10, %v1035_v14  ;;  %v1419_v15 = vpop.permute.xlu1 %1418 }
 0x2da   : > { %1436 = vst.msk [vmem:[#allocation2 + $0x6d] sm:$0x1] %vm915_vm10, %v1419_v15 }
 0x2dc   : > { %v1099_v16 = vpop.permute.xlu0 %1098 }
 0x2dd   : > { %1115 = vst.msk [vmem:[#allocation2 + $0x75] sm:$0x1] %vm915_vm10, %v1099_v16  ;;  %v1003_v17 = vpop.permute.xlu1 %1002 }
 0x2de   : > { %1019 = vst.msk [vmem:[#allocation2 + $0x72] sm:$0x1] %vm915_vm10, %v1003_v17 }
 0x2e0   : > { %v1163_v18 = vpop.permute.xlu0 %1162 }
 0x2e1   : > { %1179 = vst.msk [vmem:[#allocation2 + $0x77] sm:$0x1] %vm915_vm10, %v1163_v18  ;;  %v1067_v19 = vpop.permute.xlu1 %1066  ;;  %v1451_v20 = vld [vmem:[#allocation2 + $0x68] sm:$0x3f] }
 0x2e2   : > { %1083 = vst.msk [vmem:[#allocation2 + $0x74] sm:$0x1] %vm915_vm10, %v1067_v19  ;;  %3157 = vmatmul.mubr.msk.f32.vlgmr.msra.gmra.mrb[12].mxu1 %vm1456_vm14, %v1451_v20 }
 0x2e3   : > { %3293 = vmatpush3.bf16.msk.msra.mxu1 %vm3624_vm13, %v3621_v37 }
 0x2e4   : > { %v1325_v21 = vpop.permute.xlu0 %1324 }
 0x2e5   : > { %v1131_v22 = vpop.permute.xlu1 %1130  ;;  %1341 = vst.msk [vmem:[#allocation2 + $0x7a] sm:$0x1] %vm915_vm10, %v1325_v21 }
 0x2e6   : > { %1147 = vst.msk [vmem:[#allocation2 + $0x76] sm:$0x1] %vm915_vm10, %v1131_v22 }
 0x2e8   : > { %v1389_v23 = vpop.permute.xlu0 %1388 }
 0x2e9   : > { %1405 = vst.msk [vmem:[#allocation2 + $0x7c] sm:$0x1] %vm915_vm10, %v1389_v23  ;;  %v1293_v24 = vpop.permute.xlu1 %1292 }
 0x2ea   : > { %1309 = vst.msk [vmem:[#allocation2 + $0x79] sm:$0x1] %vm915_vm10, %v1293_v24 }
 0x2ed   : > { %v1357_v25 = vpop.permute.xlu1 %1356  ;;  %v1452_v26 = vld [vmem:[#allocation2 + $0x70] sm:$0xff] }
 0x2ee   : > { %1373 = vst.msk [vmem:[#allocation2 + $0x7b] sm:$0x1] %vm915_vm10, %v1357_v25  ;;  %3163 = vmatprep.mubr.msk.f32.mxu1 %vm1456_vm14, %v1452_v26 }
 0x2f1   : > { %v1421_v27 = vpop.permute.xlu1 %1420 }
 0x2f2   : > { %1437 = vst.msk [vmem:[#allocation2 + $0x7d] sm:$0x1] %vm915_vm10, %v1421_v27 }
 0x2f9   : > { %v1453_v37 = vld [vmem:[#allocation2 + $0x78] sm:$0x3f] }
 0x2fa   : > { %3164 = vmatmul.mubr.msk.f32.vlgmr.msra.gmra.mrb[14].mxu1 %vm1456_vm14, %v1453_v37 }
 0x2fb   : > { %3170 = vmatprep.mubr.msk.f32.mxu1 %vm1456_vm14, %v3920_v13 }
 0x325   : > { %v3116_v28 = vpop.f32.mrb[0].mxu1 }
 0x326   : > { %v1533_v29 = vpop.f32.mrb[1].mxu1 }
 0x327   : > { %v3294_v30 = vpack.c.bf16 %v3116_v28, %v1533_v29 }
 0x329   : > { %3296 = vmatprep.subr.msk.bf16.mxu1 %vm3624_vm13, %v3294_v30 }
 0x32a   : > { %3299 = vmatpush3.bf16.msk.msra.mxu1 %vm3624_vm13, %v3294_v30 }
 0x32d   : > { %3171 = vmatmul.mubr.msk.f32.vlgmr.msra.gmra.mrb[16].mxu1 %vm1456_vm14, %v3954_v31 }
 0x32e   : > { %3173 = vmatprep.mubr.msk.f32.mxu1 %vm1456_vm14, %v3959_v32 }
 0x331   : > { %3174 = vmatmul.mubr.msk.f32.gmra.mrb[18].mxu1 %vm1456_vm14, %v3968_v33 }
 0x332   : > { %3180 = vmatprep.mubr.msk.f32.mxu1 %vm1456_vm14, %v3920_v13 }
 0x355   : > { %v3123_v34 = vpop.f32.mrb[2].mxu1 }
 0x356   : > { %v1614_v35 = vpop.f32.mrb[3].mxu1 }
 0x357   : > { %v3300_v36 = vpack.c.bf16 %v3123_v34, %v1614_v35 }
 0x359   : > { %3302 = vmatprep.subr.msk.bf16.mxu1 %vm3624_vm13, %v3300_v36 }
 0x35a   : > { %3305 = vmatpush3.bf16.msk.msra.mxu1 %vm3624_vm13, %v3300_v36 }
 0x35d   : > { %3181 = vmatmul.mubr.msk.f32.vlgmr.msra.gmra.mrb[20].mxu1 %vm1456_vm14, %v3954_v31 }
 0x35e   : > { %3183 = vmatprep.mubr.msk.f32.mxu1 %vm1456_vm14, %v3959_v32 }
 0x361   : > { %v3130_v39 = vpop.f32.mrb[4].mxu1  ;;  %3184 = vmatmul.mubr.msk.f32.gmra.mrb[22].mxu1 %vm1456_vm14, %v3968_v33 }
 0x362   : > { %v1695_v40 = vpop.f32.mrb[5].mxu1  ;;  %3190 = vmatprep.mubr.msk.f32.mxu1 %vm1456_vm14, %v3920_v13 }
 0x363   : > { %v3306_v41 = vpack.c.bf16 %v3130_v39, %v1695_v40 }
 0x365   : > { %3308 = vmatprep.subr.msk.bf16.mxu1 %vm3624_vm13, %v3306_v41 }
 0x366   : > { %3311 = vmatpush3.bf16.msk.msra.mxu1 %vm3624_vm13, %v3306_v41 }
 0x369   : > { %3191 = vmatmul.mubr.msk.f32.vlgmr.msra.gmra.mrb[24].mxu1 %vm1456_vm14, %v3954_v31 }
 0x36a   : > { %3193 = vmatprep.mubr.msk.f32.mxu1 %vm1456_vm14, %v3959_v32 }
 0x36d   : > { %3194 = vmatmul.mubr.msk.f32.gmra.mrb[26].mxu1 %vm1456_vm14, %v3968_v33 }
 0x36e   : > { %3200 = vmatprep.mubr.msk.f32.mxu1 %vm1456_vm14, %v3920_v13 }
 0x39d   : > { %v3137_v42 = vpop.f32.mrb[6].mxu1 }
 0x39e   : > { %v1776_v43 = vpop.f32.mrb[7].mxu1 }
 0x39f   : > { %v3312_v44 = vpack.c.bf16 %v3137_v42, %v1776_v43 }
 0x3a1   : > { %v3144_v45 = vpop.f32.mrb[8].mxu1  ;;  %3314 = vmatprep.subr.msk.bf16.mxu1 %vm3624_vm13, %v3312_v44 }
 0x3a2   : > { %v1857_v46 = vpop.f32.mrb[9].mxu1  ;;  %3317 = vmatpush3.bf16.msk.msra.mxu1 %vm3624_vm13, %v3312_v44 }
 0x3a3   : > { %v3318_v47 = vpack.c.bf16 %v3144_v45, %v1857_v46 }
 0x3a5   : > { %3320 = vmatprep.subr.msk.bf16.mxu1 %vm3624_vm13, %v3318_v47  ;;  %3201 = vmatmul.mubr.msk.f32.vlgmr.msra.gmra.mrb[28].mxu1 %vm1456_vm14, %v3954_v31 }
 0x3a6   : > { %3323 = vmatpush3.bf16.msk.msra.mxu1 %vm3624_vm13, %v3318_v47  ;;  %3203 = vmatprep.mubr.msk.f32.mxu1 %vm1456_vm14, %v3959_v32 }
 0x3a9   : > { %v3151_v48 = vpop.f32.mrb[10].mxu1  ;;  %3204 = vmatmul.mubr.msk.f32.gmra.mrb[30].mxu1 %vm1456_vm14, %v3968_v33 }
 0x3aa   : > { %v1938_v49 = vpop.f32.mrb[11].mxu1  ;;  %3210 = vmatprep.mubr.msk.f32.mxu1 %vm1456_vm14, %v3920_v13 }
 0x3ab   : > { %v3324_v50 = vpack.c.bf16 %v3151_v48, %v1938_v49 }
 0x3ad   : > { %3326 = vmatprep.subr.msk.bf16.mxu0 %vm3624_vm13, %v3324_v50  ;;  %3342 = vmatprep.subr.msk.bf16.mxu1 %vm3624_vm13, %v3324_v50 }
 0x3ae   : > { %3211 = vmatmul.mubr.msk.f32.vlgmr.msra.gmra.mrb[32].mxu1 %vm1456_vm14, %v3954_v31  ;;  %3329 = vmatpush3.bf16.msk.msra.mxu0 %vm3624_vm13, %v3324_v50 }
 0x3af   : > { %3343 = vmatpush3.bf16.msk.msra.mxu1 %vm3624_vm13, %v3324_v50  ;;  %3213 = vmatprep.mubr.msk.f32.mxu1 %vm1456_vm14, %v3959_v32 }
 0x3b1   : > { %3221 = vmatmul.mubr.msk.f32.vlgmr.msra.gmra.mrb[4].mxu0 %vm1456_vm14, %v3954_v31 }
 0x3b2   : > { %3214 = vmatmul.mubr.msk.f32.gmra.mrb[34].mxu1 %vm1456_vm14, %v3968_v33  ;;  %3240 = vmatprep.mubr.msk.f32.mxu0 %vm1456_vm14, %v3920_v13 }
 0x3b3   : > { %3223 = vmatprep.mubr.msk.f32.mxu1 %vm1456_vm14, %v3959_v32 }
 0x3b5   : > { %v3158_v51 = vpop.f32.mrb[12].mxu1 }
 0x3b6   : > { %v2019_v52 = vpop.f32.mrb[13].mxu1  ;;  %3224 = vmatmul.mubr.msk.f32.vlgmr.msra.gmra.mrb[36].mxu1 %vm1456_vm14, %v3968_v33 }
 0x3b7   : > { %v3330_v53 = vpack.c.bf16 %v3158_v51, %v2019_v52  ;;  %3230 = vmatprep.mubr.msk.f32.mxu1 %vm1456_vm14, %v3920_v13 }
 0x3b9   : > { %3332 = vmatprep.subr.msk.bf16.mxu1 %vm3624_vm13, %v3330_v53 }
 0x3ba   : > { %3335 = vmatpush3.bf16.msk.msra.mxu1 %vm3624_vm13, %v3330_v53 }
 0x3bd   : > { %3231 = vmatmul.mubr.msk.f32.vlgmr.msra.gmra.mrb[38].mxu1 %vm1456_vm14, %v3954_v31 }
 0x3be   : > { %3233 = vmatprep.mubr.msk.f32.mxu1 %vm1456_vm14, %v3959_v32 }
 0x3c1   : > { %3234 = vmatmul.mubr.msk.f32.gmra.mrb[40].mxu1 %vm1456_vm14, %v3968_v33 }
 0x3cd   : > { %v3165_v54 = vpop.f32.mrb[14].mxu1 }
 0x3ce   : > { %v2100_v55 = vpop.f32.mrb[15].mxu1 }
 0x3cf   : > { %v3336_v56 = vpack.c.bf16 %v3165_v54, %v2100_v55 }
 0x3d1   : > { %3338 = vmatprep.subr.msk.bf16.mxu0 %vm3624_vm13, %v3336_v56 }
 0x3d2   : > { %3341 = vmatpush3.bf16.msk.msra.mxu0 %vm3624_vm13, %v3336_v56 }
 0x3d5   : > { %3241 = vmatmul.mubr.msk.f32.vlgmr.msra.gmra.mrb[6].mxu0 %vm1456_vm14, %v3954_v31 }
 0x3d6   : > { %3243 = vmatprep.mubr.msk.f32.mxu0 %vm1456_vm14, %v3959_v32 }
 0x3d9   : > { %3244 = vmatmul.mubr.msk.f32.gmra.mrb[8].mxu0 %vm1456_vm14, %v3968_v33 }
 0x400   : > { %v3172_v38 = vpop.f32.mrb[16].mxu1 }
 0x401   : > { %2831 = vst.msk [vmem:[%s4062_s26 + $0x8] sm:$0xff] %vm2829_vm15, %v3172_v38  ;;  %v2194_v57 = vpop.f32.mrb[17].mxu1 }
 0x402   : > { %2830 = vst.msk [vmem:[%s4062_s26] sm:$0xff] %vm2829_vm15, %v2194_v57 }
 0x404   : > { %v3175_v58 = vpop.f32.mrb[18].mxu1 }
 0x405   : > { %2834 = vst.msk [vmem:[%s4062_s26 + $0x18] sm:$0xf] %vm2833_vm0, %v3175_v58  ;;  %v2204_v59 = vpop.f32.mrb[19].mxu1 }
 0x406   : > { %2832 = vst.msk [vmem:[%s4062_s26 + $0x10] sm:$0xff] %vm2829_vm15, %v2204_v59 }
 0x430   : > { %v3182_v60 = vpop.f32.mrb[20].mxu1 }
 0x431   : > { %2836 = vst.msk [vmem:[%s4062_s26 + $0x28] sm:$0xff] %vm2829_vm15, %v3182_v60  ;;  %v2282_v61 = vpop.f32.mrb[21].mxu1 }
 0x432   : > { %2835 = vst.msk [vmem:[%s4062_s26 + $0x20] sm:$0xff] %vm2829_vm15, %v2282_v61 }
 0x434   : > { %v3185_v62 = vpop.f32.mrb[22].mxu1 }
 0x435   : > { %2838 = vst.msk [vmem:[%s4062_s26 + $0x38] sm:$0xf] %vm2833_vm0, %v3185_v62  ;;  %v2292_v63 = vpop.f32.mrb[23].mxu1 }
 0x436   : > { %2837 = vst.msk [vmem:[%s4062_s26 + $0x30] sm:$0xff] %vm2829_vm15, %v2292_v63 }
 0x43c   : > { %v3192_v0 = vpop.f32.mrb[24].mxu1 }
 0x43d   : > { %2840 = vst.msk [vmem:[%s4062_s26 + $0x48] sm:$0xff] %vm2829_vm15, %v3192_v0  ;;  %v2370_v1 = vpop.f32.mrb[25].mxu1 }
 0x43e   : > { %2839 = vst.msk [vmem:[%s4062_s26 + $0x40] sm:$0xff] %vm2829_vm15, %v2370_v1 }
 0x440   : > { %v3195_v2 = vpop.f32.mrb[26].mxu1 }
 0x441   : > { %2842 = vst.msk [vmem:[%s4062_s26 + $0x58] sm:$0xf] %vm2833_vm0, %v3195_v2  ;;  %v2380_v3 = vpop.f32.mrb[27].mxu1 }
 0x442   : > { %2841 = vst.msk [vmem:[%s4062_s26 + $0x50] sm:$0xff] %vm2829_vm15, %v2380_v3 }
 0x478   : > { %v3202_v4 = vpop.f32.mrb[28].mxu1 }
 0x479   : > { %2844 = vst.msk [vmem:[%s4062_s26 + $0x68] sm:$0xff] %vm2829_vm15, %v3202_v4  ;;  %v2458_v5 = vpop.f32.mrb[29].mxu1 }
 0x47a   : > { %2843 = vst.msk [vmem:[%s4062_s26 + $0x60] sm:$0xff] %vm2829_vm15, %v2458_v5 }
 0x47c   : > { %v3205_v6 = vpop.f32.mrb[30].mxu1 }
 0x47d   : > { %2846 = vst.msk [vmem:[%s4062_s26 + $0x78] sm:$0xf] %vm2833_vm0, %v3205_v6  ;;  %v2468_v7 = vpop.f32.mrb[31].mxu1 }
 0x47e   : > { %2845 = vst.msk [vmem:[%s4062_s26 + $0x70] sm:$0xff] %vm2829_vm15, %v2468_v7 }
 0x481   : > { %v3212_v8 = vpop.f32.mrb[32].mxu1 }
 0x482   : > { %2848 = vst.msk [vmem:[%s4062_s26 + $0x88] sm:$0xff] %vm2829_vm15, %v3212_v8  ;;  %v2546_v9 = vpop.f32.mrb[33].mxu1 }
 0x483   : > { %2847 = vst.msk [vmem:[%s4062_s26 + $0x80] sm:$0xff] %vm2829_vm15, %v2546_v9 }
 0x484   : > { %v3222_v10 = vpop.f32.mrb[4].mxu0 }
 0x485   : > { %v3215_v11 = vpop.f32.mrb[34].mxu1  ;;  %2852 = vst.msk [vmem:[%s4062_s26 + $0xa8] sm:$0xff] %vm2829_vm15, %v3222_v10  ;;  %v2634_v12 = vpop.f32.mrb[5].mxu0 }
 0x486   : > { %2850 = vst.msk [vmem:[%s4062_s26 + $0x98] sm:$0xf] %vm2833_vm0, %v3215_v11  ;;  %v2556_v13 = vpop.f32.mrb[35].mxu1 }
 0x487   : > { %2851 = vst.msk [vmem:[%s4062_s26 + $0xa0] sm:$0xff] %vm2829_vm15, %v2634_v12  ;;  %2849 = vst.msk [vmem:[%s4062_s26 + $0x90] sm:$0xff] %vm2829_vm15, %v2556_v13 }
 0x489   : > { %v3225_v14 = vpop.f32.mrb[36].mxu1 }
 0x48a   : > { %2854 = vst.msk [vmem:[%s4062_s26 + $0xb8] sm:$0xf] %vm2833_vm0, %v3225_v14  ;;  %v2644_v15 = vpop.f32.mrb[37].mxu1 }
 0x48b   : > { %2853 = vst.msk [vmem:[%s4062_s26 + $0xb0] sm:$0xff] %vm2829_vm15, %v2644_v15 }
 0x490   : > { %v3232_v16 = vpop.f32.mrb[38].mxu1 }
 0x491   : > { %2856 = vst.msk [vmem:[%s4062_s26 + $0xc8] sm:$0xff] %vm2829_vm15, %v3232_v16  ;;  %v2722_v17 = vpop.f32.mrb[39].mxu1 }
 0x492   : > { %2855 = vst.msk [vmem:[%s4062_s26 + $0xc0] sm:$0xff] %vm2829_vm15, %v2722_v17 }
 0x494   : > { %v3235_v18 = vpop.f32.mrb[40].mxu1 }
 0x495   : > { %2858 = vst.msk [vmem:[%s4062_s26 + $0xd8] sm:$0xf] %vm2833_vm0, %v3235_v18  ;;  %v2732_v19 = vpop.f32.mrb[41].mxu1 }
 0x496   : > { %2857 = vst.msk [vmem:[%s4062_s26 + $0xd0] sm:$0xff] %vm2829_vm15, %v2732_v19 }
 0x4a8   : > { %v3242_v20 = vpop.f32.mrb[6].mxu0 }
 0x4a9   : > { %2860 = vst.msk [vmem:[%s4062_s26 + $0xe8] sm:$0xff] %vm2829_vm15, %v3242_v20  ;;  %v2810_v21 = vpop.f32.mrb[7].mxu0 }
 0x4aa   : > { %2859 = vst.msk [vmem:[%s4062_s26 + $0xe0] sm:$0xff] %vm2829_vm15, %v2810_v21 }
 0x4ac   : > { %v3245_v22 = vpop.f32.mrb[8].mxu0 }
 0x4ad   : > { %2862 = vst.msk [vmem:[%s4062_s26 + $0xf8] sm:$0xf] %vm2833_vm0, %v3245_v22  ;;  %v2820_v23 = vpop.f32.mrb[9].mxu0 }
 0x4ae   : > { %2861 = vst.msk [vmem:[%s4062_s26 + $0xf0] sm:$0xff] %vm2829_vm15, %v2820_v23 }
 0x4af PF: > { %s15_s18 = sadd.s32 1, %s3409_s18  }
 0x4b0   : > { %p12_p4 = scmp.ge.s32.totalorder %s15_s18, 4  }
 0x4b2   :  { %14 = sbr.rel (!%p12_p4) target bundleno = 1 (0x1), region = 78 }

</bundles_post_ra>
